<compile_context>
chip_gen: v6e
topology: v6e:2x2x1
jax: 0.10.0
libtpu: 0.0.40
codegen_flags: <defaults>
</compile_context>

<pallas_src>
import math

import jax
import jax.numpy as jnp
from jax import lax
from jax.experimental import pallas as pl
from jax.experimental.pallas import tpu as pltpu


_EPS = 1e-4
_LOG_LO = math.log(_EPS)
_LOG_HI = math.log(1.0 - _EPS)


def _round_up(x, m):
    return ((x + m - 1) // m) * m


def _cdiv(a, b):
    return -(-a // b)


# ---------------------------------------------------------------------------
# Generation-aware budgets and tiling
# ---------------------------------------------------------------------------
def _gen_budget():
    """Return (focal_tile_target_bytes, vmem_limit_bytes) per TPU generation.

    v5e / v6e: 128 MiB VMEM  -> big streaming tiles, 96 MiB scoped limit.
    v7x (64 MiB per TC) / unknown: ~3 MiB tiles, <=40 MiB limit (headroom for
    compiler-internal scratch).
    """
    cap = None
    try:
        cap = getattr(pltpu.get_tpu_info(), "vmem_capacity_bytes", None)
    except Exception:
        cap = None
    if cap is not None and cap >= 96 * 1024 * 1024:
        return 8 * 1024 * 1024, 96 * 1024 * 1024
    return 3 * 1024 * 1024, 40 * 1024 * 1024


def _pick_row_tile(rows, lanes, itemsize, target_tile_bytes):
    """Largest sublane-pack-aligned row tile with tile bytes <= target.

    Sublane pack: 8 rows for f32, 16 for bf16, 32 for 1-byte dtypes.
    Prefers a tile that divides `rows` exactly (no ragged tail), but only if
    that does not shrink the tile below half the byte-target.
    """
    pack = {4: 8, 2: 16, 1: 32}.get(itemsize, 8)
    bytes_per_row = max(1, lanes * itemsize)
    max_rows = max(pack, (target_tile_bytes // bytes_per_row) // pack * pack)
    rows_p = _round_up(rows, pack)
    tr = min(max_rows, rows_p)
    if rows % tr != 0:
        lo = max(pack, (tr // 2) // pack * pack)
        for cand in range(tr, lo - 1, -pack):
            if cand > 0 and rows % cand == 0:
                tr = cand
                break
    return tr


def _pick_hw_chunk(hw):
    """HW chunk for the one-hot gather: <=2048 lanes, must divide HW."""
    if hw <= 2048:
        return hw, 1
    for c in (2048, 1024, 512, 256, 128):
        if hw % c == 0:
            return c, hw // c
    return hw, 1                      # irregular HW: single chunk fallback


# ---------------------------------------------------------------------------
# In-kernel helpers
# ---------------------------------------------------------------------------
def _poly_min_sum(pred, gt):
    """pred, gt: (N, 2P) f32 register values, x/y interleaved.

    sum over polygons of  min over the P cyclic point-rotations of
    sum_j |pred_j - rot_r(gt)_j|     (PolyMinMatchingLoss, loss_type=1 -> L1)
    """
    _, two_p = pred.shape
    p_num = two_p // 2
    best = jnp.sum(jnp.abs(pred - gt), axis=1, keepdims=True)          # r = 0
    for r in range(1, p_num):                     # static & small rotation loop
        # cyclic rotation by r points == rotation by 2r interleaved coords
        gtr = jnp.concatenate([gt[:, 2 * r:], gt[:, :2 * r]], axis=1)
        cost = jnp.sum(jnp.abs(pred - gtr), axis=1, keepdims=True)
        best = jnp.minimum(best, cost)
    # TODO(synk): pltpu.roll(gt, 2, axis=1) would avoid the per-rotation lane
    #             copies, but its lowering for sub-128 lane widths is
    #             version-sensitive; static slices are kept for portability.
    return jnp.sum(best)


# ---------------------------------------------------------------------------
# Host-side wrapper: one fused pallas_call for all losses
# ---------------------------------------------------------------------------
def fused_losses(ct_pred_nchw, ct_gt_nchw, wh_feat_nchw, wh_target,
                 ct_ind, ct_01, ex_pred2, ex_gt2, py_pred2, py_gt2):
    b, c, h, w = ct_pred_nchw.shape
    rows, lanes = b * c, h * w
    ct_pred = ct_pred_nchw.reshape(rows, lanes)     # reshape only (no copy)
    ct_gt = ct_gt_nchw.reshape(rows, lanes)

    target_tile_bytes, vmem_limit = _gen_budget()
    tr = _pick_row_tile(rows, lanes, ct_pred.dtype.itemsize, target_tile_bytes)
    n_tiles = _cdiv(rows, tr)
    need_row_mask = (rows % tr) != 0                # ragged tail masked in-kernel

    b_sz, c2, hh, ww = wh_feat_nchw.shape
    hw = hh * ww
    feat = wh_feat_nchw.reshape(b_sz, c2, hw)       # NCHW kept: no transpose/cast
    n_obj = ct_ind.shape[1]
    tgt = jnp.transpose(wh_target, (0, 2, 1)).astype(jnp.float32)  # (B, C, n) tiny
    ind3 = ct_ind.astype(jnp.int32).reshape(b_sz, 1, n_obj)
    w3 = ct_01.astype(jnp.float32).reshape(b_sz, 1, n_obj)

    chunk_hw, n_chunks = _pick_hw_chunk(hw)
    per_step = _cdiv(b_sz, n_tiles)                 # batches handled per grid step

    # ---------------------------- kernel body ------------------------------
    def kernel(ct_p_ref, ct_g_ref, feat_ref, tgt_ref, ind_ref, w_ref,
               exp_ref, exg_ref, pyp_ref, pyg_ref, out_ref):
        f32 = jnp.float32
        pid = pl.program_id(0)

        # ---- focal-loss partial sums for this row tile (every grid step) ---
        x = ct_p_ref[...].astype(f32)    # upcast right after load (bf16 safe)
        g = ct_g_ref[...].astype(f32)

        s = jax.nn.sigmoid(x)
        p = jnp.clip(s, _EPS, 1.0 - _EPS)            # net_utils.sigmoid clamp
        log_p = jnp.log(p)
        # log(1 - sigmoid(x)) = log(sigmoid(x)) - x ; clipping in log domain
        # reproduces the 1e-4 clamp semantics while saving one EUP log/elem.
        log_1mp = jnp.clip(log_p - x, _LOG_LO, _LOG_HI)
        one_m_p = 1.0 - p
        neg_w = (1.0 - g) ** 4

        pos_mask = g == 1.0
        neg_mask = g < 1.0
        if need_row_mask:                # only traced when the last tile is ragged
            gr = pid * tr + lax.broadcasted_iota(jnp.int32, (tr, 1), 0)
            valid = gr < rows
            pos_mask = jnp.logical_and(pos_mask, valid)
            neg_mask = jnp.logical_and(neg_mask, valid)

        pos_loss = jnp.where(pos_mask, log_p * one_m_p * one_m_p, 0.0)
        neg_loss = jnp.where(neg_mask, log_1mp * p * p * neg_w, 0.0)
        ps = jnp.sum(pos_loss)
        ns = jnp.sum(neg_loss)
        npos = jnp.sum(pos_mask.astype(f32))

        # ---- wh IndL1Loss1d: batches strided across grid steps -------------
        ch_iota = lax.broadcasted_iota(jnp.int32, (chunk_hw, n_obj), 0)

        def batch_body(j, carry):
            tot, wsum = carry
            b_raw = pid + j * n_tiles
            bvalid = b_raw < b_sz
            bb = jnp.minimum(b_raw, b_sz - 1)
            ind_b = ind_ref[bb]                          # (1, n_obj) int32
            w_b = w_ref[bb].astype(f32)                  # (1, n_obj)
            tgt_b = tgt_ref[bb].astype(f32)              # (c2, n_obj)

            if n_chunks == 1:
                fb = feat_ref[bb]                        # (c2, hw)
                onehot = (ch_iota == ind_b).astype(fb.dtype)
                gathered = jnp.dot(fb, onehot, preferred_element_type=f32)
            else:
                def chunk_body(kc, acc):
                    base = pl.multiple_of(kc * chunk_hw, chunk_hw)
                    fb = feat_ref[bb, :, pl.ds(base, chunk_hw)]  # (c2, chunk)
                    oh = ((ch_iota + base) == ind_b).astype(fb.dtype)
                    return acc + jnp.dot(fb, oh, preferred_element_type=f32)
                gathered = lax.fori_loop(0, n_chunks, chunk_body,
                                         jnp.zeros((c2, n_obj), f32))

            # reference IndL1Loss1d: smooth_l1(pred * w, gt * w, reduction=sum)
            d = (gathered - tgt_b) * w_b
            ad = jnp.abs(d)
            sl1 = jnp.where(ad < 1.0, 0.5 * d * d, ad - 0.5)
            tot = tot + jnp.where(bvalid, jnp.sum(sl1), 0.0)
            wsum = wsum + jnp.where(bvalid, jnp.sum(w_b), 0.0)
            return tot, wsum

        l1_tot, l1_w = lax.fori_loop(
            0, per_step, batch_body,
            (jnp.zeros((), f32), jnp.zeros((), f32)))

        # ---- write per-step partials, lane-dense (1, 8, 128) ---------------
        row = lax.broadcasted_iota(jnp.int32, (1, 8, 128), 1)
        tile = jnp.where(row == 0, ps, f32(0.0))
        tile = jnp.where(row == 1, ns, tile)
        tile = jnp.where(row == 2, npos, tile)
        tile = jnp.where(row == 3, l1_tot, tile)
        tile = jnp.where(row == 4, l1_w, tile)
        out_ref[...] = tile

        # ---- tiny polygon min-matching losses: grid step 0 only ------------
        @pl.when(pid == 0)
        def _():
            ex_sum = _poly_min_sum(exp_ref[...].astype(f32),
                                   exg_ref[...].astype(f32))
            py_sum = _poly_min_sum(pyp_ref[...].astype(f32),
                                   pyg_ref[...].astype(f32))
            t = out_ref[...]
            t = jnp.where(row == 5, ex_sum, t)
            t = jnp.where(row == 6, py_sum, t)
            out_ref[...] = t

    # --------------------------- pallas_call -------------------------------
    grid_spec = pltpu.PrefetchScalarGridSpec(
        num_scalar_prefetch=0,
        grid=(n_tiles,),
        in_specs=[
            pl.BlockSpec((tr, lanes), lambda i: (i, 0)),
            pl.BlockSpec((tr, lanes), lambda i: (i, 0)),
            pl.BlockSpec((b_sz, c2, hw), lambda i: (0, 0, 0)),
            pl.BlockSpec((b_sz, c2, n_obj), lambda i: (0, 0, 0)),
            pl.BlockSpec((b_sz, 1, n_obj), lambda i: (0, 0, 0)),
            pl.BlockSpec((b_sz, 1, n_obj), lambda i: (0, 0, 0)),
            pl.BlockSpec(ex_pred2.shape, lambda i: (0, 0)),
            pl.BlockSpec(ex_gt2.shape, lambda i: (0, 0)),
            pl.BlockSpec(py_pred2.shape, lambda i: (0, 0)),
            pl.BlockSpec(py_gt2.shape, lambda i: (0, 0)),
        ],
        out_specs=pl.BlockSpec((1, 8, 128), lambda i: (i, 0, 0)),
    )

    elems = rows * lanes
    flops = (14 * elems
             + b_sz * n_obj * hw * (1 + 2 * c2)
             + 4 * (ex_pred2.size * (ex_pred2.shape[1] // 2)
                    + py_pred2.size * (py_pred2.shape[1] // 2)))
    bytes_accessed = ((ct_pred.size + ct_gt.size) * ct_pred.dtype.itemsize
                      + feat.size * feat.dtype.itemsize
                      + 4 * (tgt.size + ind3.size + w3.size + ex_pred2.size
                             + ex_gt2.size + py_pred2.size + py_gt2.size)
                      + n_tiles * 8 * 128 * 4)
    cost = pl.CostEstimate(flops=int(flops),
                           transcendentals=int(3 * elems),
                           bytes_accessed=int(bytes_accessed))

    out = pl.pallas_call(
        kernel,
        out_shape=jax.ShapeDtypeStruct((n_tiles, 8, 128), jnp.float32),
        grid_spec=grid_spec,
        compiler_params=pltpu.CompilerParams(
            dimension_semantics=("parallel",),       # megacore-shardable on v7x
            vmem_limit_bytes=int(vmem_limit)),
        cost_estimate=cost,
    )(ct_pred, ct_gt, feat, tgt, ind3, w3, ex_pred2, ex_gt2, py_pred2, py_gt2)

    partials = jnp.sum(out[:, :, 0], axis=0)         # combine per-tile partials
    return partials, c2


# ---------------------------------------------------------------------------
# format_loss (static-shape branching, mirrors the PyTorch helper)
# ---------------------------------------------------------------------------
def _prep_poly(pred, gt):
    if gt.shape[0] == 0:
        if pred.shape[0] == 0:
            return None                   # both empty -> loss is exactly 0
        gt = jnp.zeros_like(pred)
    elif pred.shape[0] == 0:
        pred = jnp.zeros_like(gt)
    n, p_num, _ = pred.shape
    return pred.reshape(n, 2 * p_num), gt.reshape(n, 2 * p_num), n


# ---------------------------------------------------------------------------
# NetworkWrapper.forward
# ---------------------------------------------------------------------------
def network_wrapper_forward(output, batch):
    scalar_stats = {}

    ex_prep = _prep_poly(output['ex_pred'], output['i_gt_4py'])
    output['py_pred'] = [output['py_pred'][-1]]       # mirror the reference
    py_prep = _prep_poly(output['py_pred'][0], output['i_gt_py'])

    dummy = jnp.zeros((1, 2), jnp.float32)
    ex_p2, ex_g2, n_ex = ex_prep if ex_prep is not None else (dummy, dummy, 1)
    py_p2, py_g2, n_py = py_prep if py_prep is not None else (dummy, dummy, 1)

    partials, c2 = fused_losses(
        output['ct_hm'], batch['ct_hm'], output['wh'], batch['wh'],
        batch['ct_ind'], batch['ct_01'], ex_p2, ex_g2, py_p2, py_g2)

    ps, ns, npos = partials[0], partials[1], partials[2]
    ct_loss = jnp.where(npos == 0.0, -ns, -(ps + ns) / jnp.maximum(npos, 1.0))

    wh_loss = partials[3] / (partials[4] * jnp.float32(c2) + 1e-4)

    ex_loss = (partials[5] / jnp.float32(n_ex)) if ex_prep is not None \
        else jnp.zeros((), jnp.float32)
    py_single = (partials[6] / jnp.float32(n_py)) if py_prep is not None \
        else jnp.zeros((), jnp.float32)
    py_loss = py_single / len(output['py_pred'])      # len == 1

    loss = ct_loss + 0.1 * wh_loss + ex_loss + py_loss

    # TODO(synk): HungarianLoss (tp_crit) needs a combinatorial assignment
    #             (linear_sum_assignment) over the stub-net tp outputs; no
    #             clean Pallas equivalent, kept at 0.
    tp_loss = jnp.zeros((), jnp.float32)
    loss = loss + tp_loss

    scalar_stats.update({'ct_loss': ct_loss, 'wh_loss': wh_loss,
                         'ex_loss': ex_loss, 'py_loss': py_loss,
                         'tp_loss': tp_loss, 'loss': loss})
    image_stats = {}
    return output, loss, scalar_stats, image_stats


# ---------------------------------------------------------------------------
# Main: deterministic small synthetic inputs
# ---------------------------------------------------------------------------
if __name__ == "__main__":
    key = jax.random.PRNGKey(0)
    ks = jax.random.split(key, 10)

    B, C, H, W = 2, 4, 16, 16     # batch, heatmap classes, spatial
    n_obj = 8                      # max objects per image
    N_poly = 6                     # number of polygon instances
    INIT_POLY_NUM = 4              # snake_config.init_poly_num (small synthetic)
    POLY_NUM = 8                   # snake_config.poly_num      (small synthetic)

    # ---- "net" outputs (stub net: synthesized directly) ----
    ct_hm_logits = jax.random.normal(ks[0], (B, C, H, W), jnp.float32)
    wh_out = jax.random.normal(ks[1], (B, 2, H, W), jnp.float32)
    ex_pred = jax.random.normal(ks[2], (N_poly, INIT_POLY_NUM, 2), jnp.float32) * 4.0
    i_gt_4py = jax.random.normal(ks[3], (N_poly, INIT_POLY_NUM, 2), jnp.float32) * 4.0
    py_pred_last = jax.random.normal(ks[4], (N_poly, POLY_NUM, 2), jnp.float32) * 4.0
    i_gt_py = jax.random.normal(ks[5], (N_poly, POLY_NUM, 2), jnp.float32) * 4.0

    output = {
        'ct_hm': ct_hm_logits,
        'wh': wh_out,
        'ex_pred': ex_pred,
        'i_gt_4py': i_gt_4py,
        'py_pred': [py_pred_last],
        'i_gt_py': i_gt_py,
    }

    # ---- batch (ground truth) ----
    gt_ct = jax.random.uniform(ks[6], (B, C, H, W), jnp.float32) * 0.9
    gt_ct = gt_ct.at[0, 1, 4, 7].set(1.0)
    gt_ct = gt_ct.at[0, 0, 10, 12].set(1.0)
    gt_ct = gt_ct.at[1, 2, 8, 3].set(1.0)

    wh_gt = jax.random.normal(ks[7], (B, n_obj, 2), jnp.float32) * 2.0
    ct_ind = jax.random.randint(ks[8], (B, n_obj), 0, H * W, jnp.int32)
    ct_01 = jnp.zeros((B, n_obj), jnp.float32)
    ct_01 = ct_01.at[0, :5].set(1.0)
    ct_01 = ct_01.at[1, :3].set(1.0)

    batch = {
        'ct_hm': gt_ct,
        'wh': wh_gt,
        'ct_ind': ct_ind,
        'ct_01': ct_01,
    }

    out, loss, scalar_stats, image_stats = network_wrapper_forward(output, batch)
    jax.block_until_ready(loss)
    jax.block_until_ready(scalar_stats)
    print("KERNEL_OK")
</pallas_src>

<mosaic_0001>
module attributes {stable_mosaic.version = 11 : i64} {
  func.func @kernel(%arg0: i32, %arg1: memref<8x256xf32, #tpu.memory_space<vmem>>, %arg2: memref<8x256xf32, #tpu.memory_space<vmem>>, %arg3: memref<2x2x256xf32, #tpu.memory_space<vmem>>, %arg4: memref<2x2x8xf32, #tpu.memory_space<vmem>>, %arg5: memref<2x1x8xi32, #tpu.memory_space<vmem>>, %arg6: memref<2x1x8xf32, #tpu.memory_space<vmem>>, %arg7: memref<6x8xf32, #tpu.memory_space<vmem>>, %arg8: memref<6x8xf32, #tpu.memory_space<vmem>>, %arg9: memref<6x16xf32, #tpu.memory_space<vmem>>, %arg10: memref<6x16xf32, #tpu.memory_space<vmem>>, %arg11: memref<1x8x128xf32, #tpu.memory_space<vmem>>) attributes {dimension_semantics = [#tpu.dimension_semantics<parallel>], iteration_bounds = array<i64: 1>, scalar_prefetch = 0 : i64, scratch_operands = 0 : i64, tpu.core_type = #tpu.core_type<tc>, window_params = [{transform_indices = @transform_0, window_bounds = array<i64: 8, 256>}, {transform_indices = @transform_1, window_bounds = array<i64: 8, 256>}, {pipeline_mode = #tpu.pipeline_mode<synchronous>, transform_indices = @transform_2, window_bounds = array<i64: 2, 2, 256>}, {pipeline_mode = #tpu.pipeline_mode<synchronous>, transform_indices = @transform_3, window_bounds = array<i64: 2, 2, 8>}, {pipeline_mode = #tpu.pipeline_mode<synchronous>, transform_indices = @transform_4, window_bounds = array<i64: 2, 1, 8>}, {pipeline_mode = #tpu.pipeline_mode<synchronous>, transform_indices = @transform_5, window_bounds = array<i64: 2, 1, 8>}, {pipeline_mode = #tpu.pipeline_mode<synchronous>, transform_indices = @transform_6, window_bounds = array<i64: 6, 8>}, {pipeline_mode = #tpu.pipeline_mode<synchronous>, transform_indices = @transform_7, window_bounds = array<i64: 6, 8>}, {pipeline_mode = #tpu.pipeline_mode<synchronous>, transform_indices = @transform_8, window_bounds = array<i64: 6, 16>}, {pipeline_mode = #tpu.pipeline_mode<synchronous>, transform_indices = @transform_9, window_bounds = array<i64: 6, 16>}, {transform_indices = @transform_10, window_bounds = array<i64: 1, 8, 128>}]} {
    %c0 = arith.constant 0 : index
    %c0_0 = arith.constant 0 : index
    %0 = vector.load %arg1[%c0, %c0_0] : memref<8x256xf32, #tpu.memory_space<vmem>>, vector<8x256xf32>
    %c0_1 = arith.constant 0 : index
    %c0_2 = arith.constant 0 : index
    %1 = vector.load %arg2[%c0_1, %c0_2] : memref<8x256xf32, #tpu.memory_space<vmem>>, vector<8x256xf32>
    %2 = arith.negf %0 : vector<8x256xf32>
    %3 = math.exp %2 : vector<8x256xf32>
    %cst = arith.constant 1.000000e+00 : f32
    %4 = vector.broadcast %cst : f32 to vector<8x256xf32>
    %5 = arith.addf %4, %3 : vector<8x256xf32>
    %6 = arith.divf %4, %5 : vector<8x256xf32>
    %cst_3 = arith.constant 9.99999974E-5 : f32
    %cst_4 = arith.constant 0.999899983 : f32
    %7 = vector.broadcast %cst_3 : f32 to vector<8x256xf32>
    %8 = arith.maximumf %7, %6 : vector<8x256xf32>
    %9 = vector.broadcast %cst_4 : f32 to vector<8x256xf32>
    %10 = arith.minimumf %9, %8 : vector<8x256xf32>
    %11 = math.log %10 : vector<8x256xf32>
    %12 = arith.subf %11, %0 : vector<8x256xf32>
    %cst_5 = arith.constant -9.21034049 : f32
    %cst_6 = arith.constant -1.000050e-04 : f32
    %13 = vector.broadcast %cst_5 : f32 to vector<8x256xf32>
    %14 = arith.maximumf %13, %12 : vector<8x256xf32>
    %15 = vector.broadcast %cst_6 : f32 to vector<8x256xf32>
    %16 = arith.minimumf %15, %14 : vector<8x256xf32>
    %cst_7 = arith.constant 1.000000e+00 : f32
    %17 = vector.broadcast %cst_7 : f32 to vector<8x256xf32>
    %18 = arith.subf %17, %10 : vector<8x256xf32>
    %cst_8 = arith.constant 1.000000e+00 : f32
    %19 = vector.broadcast %cst_8 : f32 to vector<8x256xf32>
    %20 = arith.subf %19, %1 : vector<8x256xf32>
    %21 = arith.mulf %20, %20 : vector<8x256xf32>
    %22 = arith.mulf %21, %21 : vector<8x256xf32>
    %cst_9 = arith.constant 1.000000e+00 : f32
    %23 = vector.broadcast %cst_9 : f32 to vector<8x256xf32>
    %24 = arith.cmpf oeq, %1, %23 : vector<8x256xf32>
    %cst_10 = arith.constant 1.000000e+00 : f32
    %25 = vector.broadcast %cst_10 : f32 to vector<8x256xf32>
    %26 = arith.cmpf olt, %1, %25 : vector<8x256xf32>
    %27 = arith.mulf %11, %18 : vector<8x256xf32>
    %28 = arith.mulf %27, %18 : vector<8x256xf32>
    %cst_11 = arith.constant 0.000000e+00 : f32
    %29 = vector.broadcast %cst_11 : f32 to vector<8x256xf32>
    %30 = arith.select %24, %28, %29 : vector<8x256xi1>, vector<8x256xf32>
    %31 = arith.mulf %16, %10 : vector<8x256xf32>
    %32 = arith.mulf %31, %10 : vector<8x256xf32>
    %33 = arith.mulf %32, %22 : vector<8x256xf32>
    %cst_12 = arith.constant 0.000000e+00 : f32
    %34 = vector.broadcast %cst_12 : f32 to vector<8x256xf32>
    %35 = arith.select %26, %33, %34 : vector<8x256xi1>, vector<8x256xf32>
    %36 = vector.shape_cast %30 : vector<8x256xf32> to vector<1x8x256xf32>
    %cst_13 = arith.constant dense<0.000000e+00> : vector<1xf32>
    %37 = vector.multi_reduction <add>, %36, %cst_13 [1, 2] : vector<1x8x256xf32> to vector<1xf32>
    %38 = vector.shape_cast %37 : vector<1xf32> to vector<1x1x1xf32>
    %39 = vector.extract %38[0, 0, 0] : f32 from vector<1x1x1xf32>
    %40 = vector.shape_cast %35 : vector<8x256xf32> to vector<1x8x256xf32>
    %cst_14 = arith.constant dense<0.000000e+00> : vector<1xf32>
    %41 = vector.multi_reduction <add>, %40, %cst_14 [1, 2] : vector<1x8x256xf32> to vector<1xf32>
    %42 = vector.shape_cast %41 : vector<1xf32> to vector<1x1x1xf32>
    %43 = vector.extract %42[0, 0, 0] : f32 from vector<1x1x1xf32>
    %44 = arith.extui %24 : vector<8x256xi1> to vector<8x256xi32>
    %45 = arith.sitofp %44 : vector<8x256xi32> to vector<8x256xf32>
    %46 = vector.shape_cast %45 : vector<8x256xf32> to vector<1x8x256xf32>
    %cst_15 = arith.constant dense<0.000000e+00> : vector<1xf32>
    %47 = vector.multi_reduction <add>, %46, %cst_15 [1, 2] : vector<1x8x256xf32> to vector<1xf32>
    %48 = vector.shape_cast %47 : vector<1xf32> to vector<1x1x1xf32>
    %49 = vector.extract %48[0, 0, 0] : f32 from vector<1x1x1xf32>
    %50 = tpu.iota {dimensions = array<i32: 0>} : vector<256x8xi32>
    %cst_16 = arith.constant 0.000000e+00 : f32
    %cst_17 = arith.constant 0.000000e+00 : f32
    %c0_i32 = arith.constant 0 : i32
    %c2_i32 = arith.constant 2 : i32
    %51 = arith.addi %c0_i32, %c2_i32 : i32
    %c1_i32 = arith.constant 1 : i32
    %52:2 = scf.for %arg12 = %c0_i32 to %51 step %c1_i32 iter_args(%arg13 = %cst_16, %arg14 = %cst_17) -> (f32, f32)  : i32 {
      %c1_i32_28 = arith.constant 1 : i32
      %79 = arith.muli %arg12, %c1_i32_28 : i32
      %80 = arith.addi %arg0, %79 : i32
      %c2_i32_29 = arith.constant 2 : i32
      %81 = arith.cmpi slt, %80, %c2_i32_29 : i32
      %c1_i32_30 = arith.constant 1 : i32
      %82 = arith.minsi %80, %c1_i32_30 : i32
      %83 = arith.index_cast %82 : i32 to index
      %c0_31 = arith.constant 0 : index
      %c0_32 = arith.constant 0 : index
      %84 = vector.load %arg5[%83, %c0_31, %c0_32] : memref<2x1x8xi32, #tpu.memory_space<vmem>>, vector<1x1x8xi32>
      %85 = vector.shape_cast %84 : vector<1x1x8xi32> to vector<1x8xi32>
      %86 = arith.index_cast %82 : i32 to index
      %c0_33 = arith.constant 0 : index
      %c0_34 = arith.constant 0 : index
      %87 = vector.load %arg6[%86, %c0_33, %c0_34] : memref<2x1x8xf32, #tpu.memory_space<vmem>>, vector<1x1x8xf32>
      %88 = vector.shape_cast %87 : vector<1x1x8xf32> to vector<1x8xf32>
      %89 = arith.index_cast %82 : i32 to index
      %c0_35 = arith.constant 0 : index
      %c0_36 = arith.constant 0 : index
      %90 = vector.load %arg4[%89, %c0_35, %c0_36] : memref<2x2x8xf32, #tpu.memory_space<vmem>>, vector<1x2x8xf32>
      %91 = vector.shape_cast %90 : vector<1x2x8xf32> to vector<2x8xf32>
      %92 = arith.index_cast %82 : i32 to index
      %c0_37 = arith.constant 0 : index
      %c0_38 = arith.constant 0 : index
      %93 = vector.load %arg3[%92, %c0_37, %c0_38] : memref<2x2x256xf32, #tpu.memory_space<vmem>>, vector<1x2x256xf32>
      %94 = vector.shape_cast %93 : vector<1x2x256xf32> to vector<2x256xf32>
      %95 = vector.broadcast %85 : vector<1x8xi32> to vector<256x8xi32>
      %96 = arith.cmpi eq, %50, %95 : vector<256x8xi32>
      %97 = arith.extui %96 : vector<256x8xi1> to vector<256x8xi32>
      %98 = arith.sitofp %97 : vector<256x8xi32> to vector<256x8xf32>
      %cst_39 = arith.constant dense<0.000000e+00> : vector<2x8xf32>
      %99 = tpu.matmul %94, %98, %cst_39 {dimension_numbers = #tpu.dot_dimension_numbers<[1], [0], [0], [1], [0, 0, 1, 1], [], []>} : vector<2x256xf32>, vector<256x8xf32>, vector<2x8xf32> -> vector<2x8xf32>
      %100 = arith.subf %99, %91 : vector<2x8xf32>
      %101 = vector.broadcast %88 : vector<1x8xf32> to vector<2x8xf32>
      %102 = arith.mulf %100, %101 : vector<2x8xf32>
      %103 = math.absf %102 : vector<2x8xf32>
      %cst_40 = arith.constant 1.000000e+00 : f32
      %104 = vector.broadcast %cst_40 : f32 to vector<2x8xf32>
      %105 = arith.cmpf olt, %103, %104 : vector<2x8xf32>
      %cst_41 = arith.constant 5.000000e-01 : f32
      %106 = vector.broadcast %cst_41 : f32 to vector<2x8xf32>
      %107 = arith.mulf %106, %102 : vector<2x8xf32>
      %108 = arith.mulf %107, %102 : vector<2x8xf32>
      %cst_42 = arith.constant 5.000000e-01 : f32
      %109 = vector.broadcast %cst_42 : f32 to vector<2x8xf32>
      %110 = arith.subf %103, %109 : vector<2x8xf32>
      %111 = arith.select %105, %108, %110 : vector<2x8xi1>, vector<2x8xf32>
      %112 = vector.shape_cast %111 : vector<2x8xf32> to vector<1x2x8xf32>
      %cst_43 = arith.constant dense<0.000000e+00> : vector<1xf32>
      %113 = vector.multi_reduction <add>, %112, %cst_43 [1, 2] : vector<1x2x8xf32> to vector<1xf32>
      %114 = vector.shape_cast %113 : vector<1xf32> to vector<1x1x1xf32>
      %115 = vector.extract %114[0, 0, 0] : f32 from vector<1x1x1xf32>
      %cst_44 = arith.constant 0.000000e+00 : f32
      %116 = arith.select %81, %115, %cst_44 : f32
      %117 = arith.addf %arg13, %116 : f32
      %118 = vector.shape_cast %88 : vector<1x8xf32> to vector<1x1x8xf32>
      %cst_45 = arith.constant dense<0.000000e+00> : vector<1xf32>
      %119 = vector.multi_reduction <add>, %118, %cst_45 [1, 2] : vector<1x1x8xf32> to vector<1xf32>
      %120 = vector.shape_cast %119 : vector<1xf32> to vector<1x1x1xf32>
      %121 = vector.extract %120[0, 0, 0] : f32 from vector<1x1x1xf32>
      %cst_46 = arith.constant 0.000000e+00 : f32
      %122 = arith.select %81, %121, %cst_46 : f32
      %123 = arith.addf %arg14, %122 : f32
      scf.yield %117, %123 : f32, f32
    }
    %c2_i32_18 = arith.constant 2 : i32
    %53 = tpu.iota {dimensions = array<i32: 1>} : vector<1x8x128xi32>
    %c0_i32_19 = arith.constant 0 : i32
    %54 = vector.broadcast %c0_i32_19 : i32 to vector<1x8x128xi32>
    %55 = arith.cmpi eq, %53, %54 : vector<1x8x128xi32>
    %cst_20 = arith.constant 0.000000e+00 : f32
    %56 = vector.broadcast %39 : f32 to vector<1x8x128xf32>
    %57 = vector.broadcast %cst_20 : f32 to vector<1x8x128xf32>
    %58 = arith.select %55, %56, %57 : vector<1x8x128xi1>, vector<1x8x128xf32>
    %c1_i32_21 = arith.constant 1 : i32
    %59 = vector.broadcast %c1_i32_21 : i32 to vector<1x8x128xi32>
    %60 = arith.cmpi eq, %53, %59 : vector<1x8x128xi32>
    %61 = vector.broadcast %43 : f32 to vector<1x8x128xf32>
    %62 = arith.select %60, %61, %58 : vector<1x8x128xi1>, vector<1x8x128xf32>
    %c2_i32_22 = arith.constant 2 : i32
    %63 = vector.broadcast %c2_i32_22 : i32 to vector<1x8x128xi32>
    %64 = arith.cmpi eq, %53, %63 : vector<1x8x128xi32>
    %65 = vector.broadcast %49 : f32 to vector<1x8x128xf32>
    %66 = arith.select %64, %65, %62 : vector<1x8x128xi1>, vector<1x8x128xf32>
    %c3_i32 = arith.constant 3 : i32
    %67 = vector.broadcast %c3_i32 : i32 to vector<1x8x128xi32>
    %68 = arith.cmpi eq, %53, %67 : vector<1x8x128xi32>
    %69 = vector.broadcast %52#0 : f32 to vector<1x8x128xf32>
    %70 = arith.select %68, %69, %66 : vector<1x8x128xi1>, vector<1x8x128xf32>
    %c4_i32 = arith.constant 4 : i32
    %71 = vector.broadcast %c4_i32 : i32 to vector<1x8x128xi32>
    %72 = arith.cmpi eq, %53, %71 : vector<1x8x128xi32>
    %73 = vector.broadcast %52#1 : f32 to vector<1x8x128xf32>
    %74 = arith.select %72, %73, %70 : vector<1x8x128xi1>, vector<1x8x128xf32>
    %c0_23 = arith.constant 0 : index
    %c0_24 = arith.constant 0 : index
    %c0_25 = arith.constant 0 : index
    %75 = vector.load %arg11[%c0_23, %c0_24, %c0_25] : memref<1x8x128xf32, #tpu.memory_space<vmem>>, vector<1x8x128xf32>
    tpu.vector_store %arg11[%c0_23, %c0_24, %c0_25], %74 {strides = array<i32>} : memref<1x8x128xf32, #tpu.memory_space<vmem>>, vector<1x8x128xf32>,
    %c0_i32_26 = arith.constant 0 : i32
    %76 = arith.cmpi eq, %arg0, %c0_i32_26 : i32
    %77 = arith.extui %76 : i1 to i32
    %c0_i32_27 = arith.constant 0 : i32
    %78 = arith.cmpi ne, %77, %c0_i32_27 : i32
    scf.if %78 {
      %c0_28 = arith.constant 0 : index
      %c0_29 = arith.constant 0 : index
      %79 = vector.load %arg7[%c0_28, %c0_29] : memref<6x8xf32, #tpu.memory_space<vmem>>, vector<6x8xf32>
      %c0_30 = arith.constant 0 : index
      %c0_31 = arith.constant 0 : index
      %80 = vector.load %arg8[%c0_30, %c0_31] : memref<6x8xf32, #tpu.memory_space<vmem>>, vector<6x8xf32>
      %81 = arith.subf %79, %80 : vector<6x8xf32>
      %82 = math.absf %81 : vector<6x8xf32>
      %cst_32 = arith.constant dense<0.000000e+00> : vector<6xf32>
      %83 = vector.multi_reduction <add>, %82, %cst_32 [1] : vector<6x8xf32> to vector<6xf32>
      %84 = vector.shape_cast %83 : vector<6xf32> to vector<6x1xf32>
      %85 = vector.extract_strided_slice %80 {offsets = [0, 2], sizes = [6, 6], strides = [1, 1]} : vector<6x8xf32> to vector<6x6xf32>
      %86 = vector.extract_strided_slice %80 {offsets = [0, 0], sizes = [6, 2], strides = [1, 1]} : vector<6x8xf32> to vector<6x2xf32>
      %87 = tpu.concatenate %85, %86 in 1 : vector<6x6xf32>, vector<6x2xf32> -> vector<6x8xf32>
      %88 = arith.subf %79, %87 : vector<6x8xf32>
      %89 = math.absf %88 : vector<6x8xf32>
      %cst_33 = arith.constant dense<0.000000e+00> : vector<6xf32>
      %90 = vector.multi_reduction <add>, %89, %cst_33 [1] : vector<6x8xf32> to vector<6xf32>
      %91 = vector.shape_cast %90 : vector<6xf32> to vector<6x1xf32>
      %92 = arith.minimumf %84, %91 : vector<6x1xf32>
      %93 = vector.extract_strided_slice %80 {offsets = [0, 4], sizes = [6, 4], strides = [1, 1]} : vector<6x8xf32> to vector<6x4xf32>
      %94 = vector.extract_strided_slice %80 {offsets = [0, 0], sizes = [6, 4], strides = [1, 1]} : vector<6x8xf32> to vector<6x4xf32>
      %95 = tpu.concatenate %93, %94 in 1 : vector<6x4xf32>, vector<6x4xf32> -> vector<6x8xf32>
      %96 = arith.subf %79, %95 : vector<6x8xf32>
      %97 = math.absf %96 : vector<6x8xf32>
      %cst_34 = arith.constant dense<0.000000e+00> : vector<6xf32>
      %98 = vector.multi_reduction <add>, %97, %cst_34 [1] : vector<6x8xf32> to vector<6xf32>
      %99 = vector.shape_cast %98 : vector<6xf32> to vector<6x1xf32>
      %100 = arith.minimumf %92, %99 : vector<6x1xf32>
      %101 = vector.extract_strided_slice %80 {offsets = [0, 6], sizes = [6, 2], strides = [1, 1]} : vector<6x8xf32> to vector<6x2xf32>
      %102 = vector.extract_strided_slice %80 {offsets = [0, 0], sizes = [6, 6], strides = [1, 1]} : vector<6x8xf32> to vector<6x6xf32>
      %103 = tpu.concatenate %101, %102 in 1 : vector<6x2xf32>, vector<6x6xf32> -> vector<6x8xf32>
      %104 = arith.subf %79, %103 : vector<6x8xf32>
      %105 = math.absf %104 : vector<6x8xf32>
      %cst_35 = arith.constant dense<0.000000e+00> : vector<6xf32>
      %106 = vector.multi_reduction <add>, %105, %cst_35 [1] : vector<6x8xf32> to vector<6xf32>
      %107 = vector.shape_cast %106 : vector<6xf32> to vector<6x1xf32>
      %108 = arith.minimumf %100, %107 : vector<6x1xf32>
      %109 = vector.shape_cast %108 : vector<6x1xf32> to vector<1x6x1xf32>
      %cst_36 = arith.constant dense<0.000000e+00> : vector<1xf32>
      %110 = vector.multi_reduction <add>, %109, %cst_36 [1, 2] : vector<1x6x1xf32> to vector<1xf32>
      %111 = vector.shape_cast %110 : vector<1xf32> to vector<1x1x1xf32>
      %112 = vector.extract %111[0, 0, 0] : f32 from vector<1x1x1xf32>
      %c0_37 = arith.constant 0 : index
      %c0_38 = arith.constant 0 : index
      %113 = vector.load %arg9[%c0_37, %c0_38] : memref<6x16xf32, #tpu.memory_space<vmem>>, vector<6x16xf32>
      %c0_39 = arith.constant 0 : index
      %c0_40 = arith.constant 0 : index
      %114 = vector.load %arg10[%c0_39, %c0_40] : memref<6x16xf32, #tpu.memory_space<vmem>>, vector<6x16xf32>
      %115 = arith.subf %113, %114 : vector<6x16xf32>
      %116 = math.absf %115 : vector<6x16xf32>
      %cst_41 = arith.constant dense<0.000000e+00> : vector<6xf32>
      %117 = vector.multi_reduction <add>, %116, %cst_41 [1] : vector<6x16xf32> to vector<6xf32>
      %118 = vector.shape_cast %117 : vector<6xf32> to vector<6x1xf32>
      %119 = vector.extract_strided_slice %114 {offsets = [0, 2], sizes = [6, 14], strides = [1, 1]} : vector<6x16xf32> to vector<6x14xf32>
      %120 = vector.extract_strided_slice %114 {offsets = [0, 0], sizes = [6, 2], strides = [1, 1]} : vector<6x16xf32> to vector<6x2xf32>
      %121 = tpu.concatenate %119, %120 in 1 : vector<6x14xf32>, vector<6x2xf32> -> vector<6x16xf32>
      %122 = arith.subf %113, %121 : vector<6x16xf32>
      %123 = math.absf %122 : vector<6x16xf32>
      %cst_42 = arith.constant dense<0.000000e+00> : vector<6xf32>
      %124 = vector.multi_reduction <add>, %123, %cst_42 [1] : vector<6x16xf32> to vector<6xf32>
      %125 = vector.shape_cast %124 : vector<6xf32> to vector<6x1xf32>
      %126 = arith.minimumf %118, %125 : vector<6x1xf32>
      %127 = vector.extract_strided_slice %114 {offsets = [0, 4], sizes = [6, 12], strides = [1, 1]} : vector<6x16xf32> to vector<6x12xf32>
      %128 = vector.extract_strided_slice %114 {offsets = [0, 0], sizes = [6, 4], strides = [1, 1]} : vector<6x16xf32> to vector<6x4xf32>
      %129 = tpu.concatenate %127, %128 in 1 : vector<6x12xf32>, vector<6x4xf32> -> vector<6x16xf32>
      %130 = arith.subf %113, %129 : vector<6x16xf32>
      %131 = math.absf %130 : vector<6x16xf32>
      %cst_43 = arith.constant dense<0.000000e+00> : vector<6xf32>
      %132 = vector.multi_reduction <add>, %131, %cst_43 [1] : vector<6x16xf32> to vector<6xf32>
      %133 = vector.shape_cast %132 : vector<6xf32> to vector<6x1xf32>
      %134 = arith.minimumf %126, %133 : vector<6x1xf32>
      %135 = vector.extract_strided_slice %114 {offsets = [0, 6], sizes = [6, 10], strides = [1, 1]} : vector<6x16xf32> to vector<6x10xf32>
      %136 = vector.extract_strided_slice %114 {offsets = [0, 0], sizes = [6, 6], strides = [1, 1]} : vector<6x16xf32> to vector<6x6xf32>
      %137 = tpu.concatenate %135, %136 in 1 : vector<6x10xf32>, vector<6x6xf32> -> vector<6x16xf32>
      %138 = arith.subf %113, %137 : vector<6x16xf32>
      %139 = math.absf %138 : vector<6x16xf32>
      %cst_44 = arith.constant dense<0.000000e+00> : vector<6xf32>
      %140 = vector.multi_reduction <add>, %139, %cst_44 [1] : vector<6x16xf32> to vector<6xf32>
      %141 = vector.shape_cast %140 : vector<6xf32> to vector<6x1xf32>
      %142 = arith.minimumf %134, %141 : vector<6x1xf32>
      %143 = vector.extract_strided_slice %114 {offsets = [0, 8], sizes = [6, 8], strides = [1, 1]} : vector<6x16xf32> to vector<6x8xf32>
      %144 = vector.extract_strided_slice %114 {offsets = [0, 0], sizes = [6, 8], strides = [1, 1]} : vector<6x16xf32> to vector<6x8xf32>
      %145 = tpu.concatenate %143, %144 in 1 : vector<6x8xf32>, vector<6x8xf32> -> vector<6x16xf32>
      %146 = arith.subf %113, %145 : vector<6x16xf32>
      %147 = math.absf %146 : vector<6x16xf32>
      %cst_45 = arith.constant dense<0.000000e+00> : vector<6xf32>
      %148 = vector.multi_reduction <add>, %147, %cst_45 [1] : vector<6x16xf32> to vector<6xf32>
      %149 = vector.shape_cast %148 : vector<6xf32> to vector<6x1xf32>
      %150 = arith.minimumf %142, %149 : vector<6x1xf32>
      %151 = vector.extract_strided_slice %114 {offsets = [0, 10], sizes = [6, 6], strides = [1, 1]} : vector<6x16xf32> to vector<6x6xf32>
      %152 = vector.extract_strided_slice %114 {offsets = [0, 0], sizes = [6, 10], strides = [1, 1]} : vector<6x16xf32> to vector<6x10xf32>
      %153 = tpu.concatenate %151, %152 in 1 : vector<6x6xf32>, vector<6x10xf32> -> vector<6x16xf32>
      %154 = arith.subf %113, %153 : vector<6x16xf32>
      %155 = math.absf %154 : vector<6x16xf32>
      %cst_46 = arith.constant dense<0.000000e+00> : vector<6xf32>
      %156 = vector.multi_reduction <add>, %155, %cst_46 [1] : vector<6x16xf32> to vector<6xf32>
      %157 = vector.shape_cast %156 : vector<6xf32> to vector<6x1xf32>
      %158 = arith.minimumf %150, %157 : vector<6x1xf32>
      %159 = vector.extract_strided_slice %114 {offsets = [0, 12], sizes = [6, 4], strides = [1, 1]} : vector<6x16xf32> to vector<6x4xf32>
      %160 = vector.extract_strided_slice %114 {offsets = [0, 0], sizes = [6, 12], strides = [1, 1]} : vector<6x16xf32> to vector<6x12xf32>
      %161 = tpu.concatenate %159, %160 in 1 : vector<6x4xf32>, vector<6x12xf32> -> vector<6x16xf32>
      %162 = arith.subf %113, %161 : vector<6x16xf32>
      %163 = math.absf %162 : vector<6x16xf32>
      %cst_47 = arith.constant dense<0.000000e+00> : vector<6xf32>
      %164 = vector.multi_reduction <add>, %163, %cst_47 [1] : vector<6x16xf32> to vector<6xf32>
      %165 = vector.shape_cast %164 : vector<6xf32> to vector<6x1xf32>
      %166 = arith.minimumf %158, %165 : vector<6x1xf32>
      %167 = vector.extract_strided_slice %114 {offsets = [0, 14], sizes = [6, 2], strides = [1, 1]} : vector<6x16xf32> to vector<6x2xf32>
      %168 = vector.extract_strided_slice %114 {offsets = [0, 0], sizes = [6, 14], strides = [1, 1]} : vector<6x16xf32> to vector<6x14xf32>
      %169 = tpu.concatenate %167, %168 in 1 : vector<6x2xf32>, vector<6x14xf32> -> vector<6x16xf32>
      %170 = arith.subf %113, %169 : vector<6x16xf32>
      %171 = math.absf %170 : vector<6x16xf32>
      %cst_48 = arith.constant dense<0.000000e+00> : vector<6xf32>
      %172 = vector.multi_reduction <add>, %171, %cst_48 [1] : vector<6x16xf32> to vector<6xf32>
      %173 = vector.shape_cast %172 : vector<6xf32> to vector<6x1xf32>
      %174 = arith.minimumf %166, %173 : vector<6x1xf32>
      %175 = vector.shape_cast %174 : vector<6x1xf32> to vector<1x6x1xf32>
      %cst_49 = arith.constant dense<0.000000e+00> : vector<1xf32>
      %176 = vector.multi_reduction <add>, %175, %cst_49 [1, 2] : vector<1x6x1xf32> to vector<1xf32>
      %177 = vector.shape_cast %176 : vector<1xf32> to vector<1x1x1xf32>
      %178 = vector.extract %177[0, 0, 0] : f32 from vector<1x1x1xf32>
      %c0_50 = arith.constant 0 : index
      %c0_51 = arith.constant 0 : index
      %c0_52 = arith.constant 0 : index
      %179 = vector.load %arg11[%c0_50, %c0_51, %c0_52] : memref<1x8x128xf32, #tpu.memory_space<vmem>>, vector<1x8x128xf32>
      %c5_i32 = arith.constant 5 : i32
      %180 = vector.broadcast %c5_i32 : i32 to vector<1x8x128xi32>
      %181 = arith.cmpi eq, %53, %180 : vector<1x8x128xi32>
      %182 = vector.broadcast %112 : f32 to vector<1x8x128xf32>
      %183 = arith.select %181, %182, %179 : vector<1x8x128xi1>, vector<1x8x128xf32>
      %c6_i32 = arith.constant 6 : i32
      %184 = vector.broadcast %c6_i32 : i32 to vector<1x8x128xi32>
      %185 = arith.cmpi eq, %53, %184 : vector<1x8x128xi32>
      %186 = vector.broadcast %178 : f32 to vector<1x8x128xf32>
      %187 = arith.select %185, %186, %183 : vector<1x8x128xi1>, vector<1x8x128xf32>
      %c0_53 = arith.constant 0 : index
      %c0_54 = arith.constant 0 : index
      %c0_55 = arith.constant 0 : index
      %188 = vector.load %arg11[%c0_53, %c0_54, %c0_55] : memref<1x8x128xf32, #tpu.memory_space<vmem>>, vector<1x8x128xf32>
      tpu.vector_store %arg11[%c0_53, %c0_54, %c0_55], %187 {strides = array<i32>} : memref<1x8x128xf32, #tpu.memory_space<vmem>>, vector<1x8x128xf32>,
    } else {
    }
    return
  }
  func.func @transform_0(%arg0: i32) -> (i32, i32) {
    %c0_i32 = arith.constant 0 : i32
    %c0_i32_0 = arith.constant 0 : i32
    return %arg0, %c0_i32 : i32, i32
  }
  func.func @transform_1(%arg0: i32) -> (i32, i32) {
    %c0_i32 = arith.constant 0 : i32
    %c0_i32_0 = arith.constant 0 : i32
    return %arg0, %c0_i32 : i32, i32
  }
  func.func @transform_2(%arg0: i32) -> (i32, i32, i32) {
    %c0_i32 = arith.constant 0 : i32
    %c0_i32_0 = arith.constant 0 : i32
    %c0_i32_1 = arith.constant 0 : i32
    %c0_i32_2 = arith.constant 0 : i32
    return %c0_i32, %c0_i32_0, %c0_i32_1 : i32, i32, i32
  }
  func.func @transform_3(%arg0: i32) -> (i32, i32, i32) {
    %c0_i32 = arith.constant 0 : i32
    %c0_i32_0 = arith.constant 0 : i32
    %c0_i32_1 = arith.constant 0 : i32
    %c0_i32_2 = arith.constant 0 : i32
    return %c0_i32, %c0_i32_0, %c0_i32_1 : i32, i32, i32
  }
  func.func @transform_4(%arg0: i32) -> (i32, i32, i32) {
    %c0_i32 = arith.constant 0 : i32
    %c0_i32_0 = arith.constant 0 : i32
    %c0_i32_1 = arith.constant 0 : i32
    %c0_i32_2 = arith.constant 0 : i32
    return %c0_i32, %c0_i32_0, %c0_i32_1 : i32, i32, i32
  }
  func.func @transform_5(%arg0: i32) -> (i32, i32, i32) {
    %c0_i32 = arith.constant 0 : i32
    %c0_i32_0 = arith.constant 0 : i32
    %c0_i32_1 = arith.constant 0 : i32
    %c0_i32_2 = arith.constant 0 : i32
    return %c0_i32, %c0_i32_0, %c0_i32_1 : i32, i32, i32
  }
  func.func @transform_6(%arg0: i32) -> (i32, i32) {
    %c0_i32 = arith.constant 0 : i32
    %c0_i32_0 = arith.constant 0 : i32
    %c0_i32_1 = arith.constant 0 : i32
    return %c0_i32, %c0_i32_0 : i32, i32
  }
  func.func @transform_7(%arg0: i32) -> (i32, i32) {
    %c0_i32 = arith.constant 0 : i32
    %c0_i32_0 = arith.constant 0 : i32
    %c0_i32_1 = arith.constant 0 : i32
    return %c0_i32, %c0_i32_0 : i32, i32
  }
  func.func @transform_8(%arg0: i32) -> (i32, i32) {
    %c0_i32 = arith.constant 0 : i32
    %c0_i32_0 = arith.constant 0 : i32
    %c0_i32_1 = arith.constant 0 : i32
    return %c0_i32, %c0_i32_0 : i32, i32
  }
  func.func @transform_9(%arg0: i32) -> (i32, i32) {
    %c0_i32 = arith.constant 0 : i32
    %c0_i32_0 = arith.constant 0 : i32
    %c0_i32_1 = arith.constant 0 : i32
    return %c0_i32, %c0_i32_0 : i32, i32
  }
  func.func @transform_10(%arg0: i32) -> (i32, i32, i32) {
    %c0_i32 = arith.constant 0 : i32
    %c0_i32_0 = arith.constant 0 : i32
    %c0_i32_1 = arith.constant 0 : i32
    return %arg0, %c0_i32, %c0_i32_0 : i32, i32, i32
  }
}

</mosaic_0001>

<bundles_post_ra>
// kernel: tpu_custom_call.1
= control target key start
LH: loop header
LB: loop body
LE: loop exit
PB: predicated region body
PF: predicated region fallthrough
CT: control target
= control target key end

     0   :  { %15 = vsyncpa [#allocation3], 0  ;;  %s1570_s0 = inlined_call_operand.hbm [shape: f32[8,256], index: 0, kind: input, shape index: {}]   ;;  %s1571_s1 = inlined_call_operand.hbm [shape: f32[8,256], index: 1, kind: input, shape index: {}]   ;;  %s1572_s2 = inlined_call_operand.hbm [shape: f32[2,2,256], index: 2, kind: input, shape index: {}]   ;;  %s1573_s3 = inlined_call_operand.hbm [shape: f32[2,2,8], index: 3, kind: input, shape index: {}]   ;;  %s1574_s4 = inlined_call_operand.hbm [shape: s32[2,1,8], index: 4, kind: input, shape index: {}]   ;;  %s1575_s5 = inlined_call_operand.hbm [shape: f32[2,1,8], index: 5, kind: input, shape index: {}]   ;;  %s1576_s6 = inlined_call_operand.vmem [shape: f32[6,8], index: 6, kind: input, shape index: {}]   ;;  %s1577_s7 = inlined_call_operand.hbm [shape: f32[6,8], index: 7, kind: input, shape index: {}]   ;;  %s1578_s8 = inlined_call_operand.hbm [shape: f32[6,16], index: 8, kind: input, shape index: {}]   ;;  %s1579_s9 = inlined_call_operand.vmem [shape: f32[6,16], index: 9, kind: input, shape index: {}]   ;;  %s1580_s10 = inlined_call_operand.hbm [shape: f32[1,8,128], index: 10, kind: output, shape index: {}]  }
   0x1   :  { %16 = vsyncpa [#allocation6], 0 }
   0x2   :  { %17 = vsyncpa [#allocation9], 0 }
   0x3   :  { %18 = vsyncpa [#allocation12], 0 }
   0x4   :  { %19 = vsyncpa [#allocation15], 0 }
   0x5   :  { %20 = vsyncpa [#allocation4], 0  ;;  %s1147_s13 = smov [#allocation5]   ;;  %s1148_s15 = smov [#allocation8]  }
   0x6   :  { %s37_s14 = sshll.u32 %s1147_s13, 4  ;;  %s58_s16 = sshll.u32 %s1148_s15, 4  ;;  %s38_s14 = int_to_ptr.vmem [resolvable:$true] %s37_s14  ;;  %s59_s16 = int_to_ptr.vmem [resolvable:$true] %s58_s16 }
   0x7   :  { %s939_s17 = scalar_lea.vmem %s38_s14, 256  ;;  %p944_p1 = scmp.lt.s32.totalorder %s38_s14, %s38_s14 }
   0x8   :  { %p940_p0 = scmp.ne.s32.totalorder %s38_s14, %s939_s17  ;;  %p945_p2 = scmp.lt.s32.totalorder %s939_s17, %s939_s17 }
   0xa   :  { %p946_p3 = por %p945_p2, %p944_p1 }
   0xc   :  { %p947_p4 = pnand %p946_p3, %p940_p0 }
   0xe   :  { %950 = shalt.err (!%p947_p4)
}
   0xf   :  { %40 = dma.hbm_to_vmem [thread:$0]  %s1571_s1, 256, %s38_s14, [#allocation6]  }
  0x10   :  { %s959_s20 = scalar_lea.vmem %s59_s16, 64  ;;  %p964_p6 = scmp.lt.s32.totalorder %s59_s16, %s59_s16 }
  0x11   :  { %p960_p5 = scmp.ne.s32.totalorder %s59_s16, %s959_s20  ;;  %p965_p7 = scmp.lt.s32.totalorder %s959_s20, %s959_s20 }
  0x13   :  { %p966_p8 = por %p965_p7, %p964_p6 }
  0x15   :  { %p967_p9 = pnand %p966_p8, %p960_p5 }
  0x17   :  { %970 = shalt.err (!%p967_p9)
}
  0x18   :  { %s1149_s21 = smov 32   ;;  %s1150_s22 = smov 2  }
  0x19   :  { %64 = dma.hbm_to_vmem [thread:$0]  %s1573_s3, 64, %s59_s16, [#allocation9], %s1149_s21, %s1149_s21, %s1150_s22  }
  0x1a   :  { %s1151_s25 = smov [#allocation11]   ;;  %s1152_s27 = smov [#allocation2]  }
  0x1b   :  { %s82_s26 = sshll.u32 %s1151_s25, 4  ;;  %s27_s28 = sshll.u32 %s1152_s27, 4  ;;  %s83_s26 = int_to_ptr.vmem [resolvable:$true] %s82_s26  ;;  %s28_s28 = int_to_ptr.vmem [resolvable:$true] %s27_s28 }
  0x1c   :  { %s979_s1 = scalar_lea.vmem %s83_s26, 32  ;;  %p984_p11 = scmp.lt.s32.totalorder %s83_s26, %s83_s26 }
  0x1d   :  { %p980_p10 = scmp.ne.s32.totalorder %s83_s26, %s979_s1  ;;  %p985_p12 = scmp.lt.s32.totalorder %s979_s1, %s979_s1 }
  0x1f   :  { %p986_p13 = por %p985_p12, %p984_p11 }
  0x21   :  { %p987_p0 = pnand %p986_p13, %p980_p10 }
  0x23   :  { %990 = shalt.err (!%p987_p0)
}
  0x24   :  { %s1153_s29 = smov 16   ;;  %s1154_s30 = smov 1  }
  0x25   :  { %88 = dma.hbm_to_vmem [thread:$0]  %s1575_s5, 32, %s83_s26, [#allocation12], %s1153_s29, %s1153_s29, %s1154_s30  }
  0x26   :  { %s999_s12 = scalar_lea.vmem %s28_s28, 256  ;;  %p1004_p2 = scmp.lt.s32.totalorder %s28_s28, %s28_s28 }
  0x27   :  { %p1000_p1 = scmp.ne.s32.totalorder %s28_s28, %s999_s12  ;;  %p1005_p3 = scmp.lt.s32.totalorder %s999_s12, %s999_s12 }
  0x29   :  { %p1006_p4 = por %p1005_p3, %p1004_p2 }
  0x2b   :  { %p1007_p5 = pnand %p1006_p4, %p1000_p1 }
  0x2d   :  { %1010 = shalt.err (!%p1007_p5)
}
  0x2e   :  { %30 = dma.hbm_to_vmem [thread:$0]  %s1570_s0, 256, %s28_s28, [#allocation3]  }
  0x2f   :  { %s1155_s15 = smov [#allocation7]  }
  0x30   :  { %s46_s16 = sshll.u32 %s1155_s15, 4  ;;  %s47_s16 = int_to_ptr.vmem [resolvable:$true] %s46_s16 }
  0x31   :  { %s1019_s17 = scalar_lea.vmem %s47_s16, 128  ;;  %p1024_p7 = scmp.lt.s32.totalorder %s47_s16, %s47_s16 }
  0x32   :  { %p1020_p6 = scmp.ne.s32.totalorder %s47_s16, %s1019_s17  ;;  %p1025_p8 = scmp.lt.s32.totalorder %s1019_s17, %s1019_s17 }
  0x34   :  { %p1026_p9 = por %p1025_p8, %p1024_p7 }
  0x36   :  { %p1027_p10 = pnand %p1026_p9, %p1020_p6 }
  0x38   :  { %1030 = shalt.err (!%p1027_p10)
}
  0x39   :  { %s1156_s5 = smov 64   ;;  %s1157_s18 = smov 4  }
  0x3a   :  { %52 = dma.hbm_to_vmem [thread:$0]  %s1572_s2, 128, %s47_s16, [#allocation6], %s1156_s5, %s1156_s5, %s1157_s18  }
  0x3b   :  { %s1158_s21 = smov [#allocation10]   ;;  %s1159_s0 = smov [#allocation13]  }
  0x3c   :  { %s70_s23 = sshll.u32 %s1158_s21, 4  ;;  %s97_s24 = sshll.u32 %s1159_s0, 4  ;;  %s71_s23 = int_to_ptr.vmem [resolvable:$true] %s70_s23  ;;  %s98_s24 = int_to_ptr.vmem [resolvable:$true] %s97_s24 }
  0x3d   :  { %s1039_s25 = scalar_lea.vmem %s71_s23, 32  ;;  %p1044_p12 = scmp.lt.s32.totalorder %s71_s23, %s71_s23 }
  0x3e   :  { %p1040_p11 = scmp.ne.s32.totalorder %s71_s23, %s1039_s25  ;;  %p1045_p13 = scmp.lt.s32.totalorder %s1039_s25, %s1039_s25 }
  0x40   :  { %p1046_p0 = por %p1045_p13, %p1044_p12 }
  0x42   :  { %p1047_p1 = pnand %p1046_p0, %p1040_p11 }
  0x44   :  { %1050 = shalt.err (!%p1047_p1)
}
  0x45   :  { %76 = dma.hbm_to_vmem [thread:$0]  %s1574_s4, 32, %s71_s23, [#allocation9], %s1153_s29, %s1153_s29, %s1154_s30  }
  0x46   :  { %s1059_s2 = scalar_lea.vmem %s98_s24, 128  ;;  %p1064_p3 = scmp.lt.s32.totalorder %s98_s24, %s98_s24 }
  0x47   :  { %p1060_p2 = scmp.ne.s32.totalorder %s98_s24, %s1059_s2  ;;  %p1065_p4 = scmp.lt.s32.totalorder %s1059_s2, %s1059_s2 }
  0x49   :  { %p1066_p5 = por %p1065_p4, %p1064_p3 }
  0x4b   :  { %p1067_p6 = pnand %p1066_p5, %p1060_p2 }
  0x4d   :  { %1070 = shalt.err (!%p1067_p6)
}
  0x4e   :  { %100 = dma.hbm_to_vmem [thread:$0]  %s1577_s7, 128, %s98_s24, [#allocation12]  }
  0x4f   :  { %s1160_s11 = smov [#allocation14]  }
  0x50   :  { %s107_s3 = sshll.u32 %s1160_s11, 4  ;;  %s108_s3 = int_to_ptr.vmem [resolvable:$true] %s107_s3 }
  0x51   :  { %s1079_s12 = scalar_lea.vmem %s108_s3, 128  ;;  %p1084_p8 = scmp.lt.s32.totalorder %s108_s3, %s108_s3 }
  0x52   :  { %p1080_p7 = scmp.ne.s32.totalorder %s108_s3, %s1079_s12  ;;  %p1085_p9 = scmp.lt.s32.totalorder %s1079_s12, %s1079_s12 }
  0x54   :  { %p1086_p10 = por %p1085_p9, %p1084_p8 }
  0x56   :  { %p1087_p11 = pnand %p1086_p10, %p1080_p7 }
  0x58   :  { %1090 = shalt.err (!%p1087_p11)
}
  0x59   :  { %110 = dma.hbm_to_vmem [thread:$0]  %s1578_s8, 128, %s108_s3, [#allocation15]  }
  0x5a   :  { %1123 = dma.done.wait [#allocation3], 256  }
  0x5b   :  { %1124 = vsyncadd [#allocation3], 4294967040 }
  0x5c   :  { %1125 = dma.done.wait [#allocation6], 384  }
  0x5d   :  { %1126 = vsyncadd [#allocation6], 4294966912 }
  0x5e   :  { %1127 = dma.done.wait [#allocation9], 96  }
  0x5f   :  { %1128 = vsyncadd [#allocation9], 4294967200 }
  0x60   :  { %1129 = dma.done.wait [#allocation12], 160  }
  0x61   :  { %1130 = vsyncadd [#allocation12], 4294967136 }
  0x62   :  { %1131 = dma.done.wait [#allocation15], 128  }
  0x63   :  { %1132 = vsyncadd [#allocation15], 4294967168  ;;  %v137_v0 = vld [vmem:[#allocation2] sm:$0xff]  ;;  %v138_v1 = vld [vmem:[#allocation2 + $0x8] sm:$0xff]  ;;  %v1161_v6 = vmov 0.0   ;;  %v227_v54 = vlaneseq  ;;  %s1368_s13 = smov 0.0  }
  0x64   :  { %v139_v2 = vld [vmem:[#allocation5] sm:$0xff]  ;;  %v140_v3 = vld [vmem:[#allocation5 + $0x8] sm:$0xff]  ;;  %v743_v4 = vmul.f32 -1.442695, %v137_v0  ;;  %v744_v5 = vmul.f32 -1.442695, %v138_v1 }
  0x65   :  { %vm175_vm0 = vcmp.eq.f32.partialorder %v139_v2, 1.0  ;;  %vm176_vm1 = vcmp.eq.f32.partialorder %v140_v3, 1.0  ;;  %v169_v25 = vsub.f32 1.0, %v139_v2  ;;  %v170_v27 = vsub.f32 1.0, %v140_v3  ;;  %s1370_s14 = smov 0.0   ;;  %s1372_s15 = smov 0  }
  0x66   :  { %919 = vpow2.f32 %v743_v4  ;;  %v745_v7 = vsel %vm175_vm0, 1.0, %v1161_v6  ;;  %v746_v8 = vsel %vm176_vm1, 1.0, %v1161_v6  ;;  %vm177_vm2 = vcmp.lt.f32.partialorder %v139_v2, 1.0 }
  0x67   :  { %921 = vpow2.f32 %v744_v5  ;;  %v217_v9 = vadd.f32 %v746_v8, %v745_v7  ;;  %v171_v34 = vmul.f32 %v169_v25, %v169_v25  ;;  %v172_v37 = vmul.f32 %v170_v27, %v170_v27 }
  0x68   :  { %vm178_vm3 = vcmp.lt.f32.partialorder %v140_v3, 1.0  ;;  %v1267_v55 = vshrl.u32 %v227_v54, 7 }
  0x69   :  { %218 = vadd.xlane.f32.xlu1 %v217_v9  ;;  %v173_v43 = vmul.f32 %v171_v34, %v171_v34  ;;  %v174_v45 = vmul.f32 %v172_v37, %v172_v37 }
  0x6a   :  { %v1270_v56 = vadd.s32 8, %v1267_v55  ;;  %v1273_v57 = vadd.s32 16, %v1267_v55  ;;  %v1276_v58 = vadd.s32 24, %v1267_v55  ;;  %v1279_v59 = vadd.s32 32, %v1267_v55 }
  0x6b   :  { %v1282_v60 = vadd.s32 40, %v1267_v55  ;;  %v1285_v61 = vadd.s32 48, %v1267_v55  ;;  %v1288_v62 = vadd.s32 56, %v1267_v55  ;;  %v1291_v63 = vadd.s32 64, %v1267_v55 }
  0x6c   :  { %v1300_v2 = vadd.s32 88, %v1267_v55  ;;  %v1303_v3 = vadd.s32 96, %v1267_v55  ;;  %v1306_v4 = vadd.s32 104, %v1267_v55  ;;  %v1309_v5 = vadd.s32 112, %v1267_v55 }
  0x6d   :  { %v1312_v6 = vadd.s32 120, %v1267_v55  ;;  %v1315_v7 = vadd.s32 128, %v1267_v55  ;;  %v1318_v8 = vadd.s32 136, %v1267_v55  ;;  %v1321_v9 = vadd.s32 144, %v1267_v55 }
  0x73   :  { %v920_v10 = vpop.eup %919 }
  0x74   :  { %v922_v11 = vpop.eup %921  ;;  %v147_v12 = vadd.f32 1.0, %v920_v10  ;;  %v1324_v10 = vadd.s32 152, %v1267_v55 }
  0x75   :  { %v148_v13 = vadd.f32 1.0, %v922_v11  ;;  %v1327_v11 = vadd.s32 160, %v1267_v55 }
  0x76   :  { %923 = vrcp.f32 %v147_v12  ;;  %v1330_v12 = vadd.s32 168, %v1267_v55 }
  0x77   :  { %925 = vrcp.f32 %v148_v13  ;;  %v1333_v13 = vadd.s32 176, %v1267_v55 }
  0x83   :  { %v924_v14 = vpop.eup %923 }
  0x84   :  { %v926_v15 = vpop.eup %925  ;;  %v153_v16 = vmax.f32 %v924_v14, 0.0001  ;;  %v1336_v14 = vadd.s32 184, %v1267_v55 }
  0x85   :  { %v154_v17 = vmax.f32 %v926_v15, 0.0001  ;;  %v1339_v15 = vadd.s32 192, %v1267_v55 }
  0x86   :  { %v155_v18 = vmin.f32 %v153_v16, 0.9999  ;;  %v1342_v16 = vadd.s32 200, %v1267_v55 }
  0x87   :  { %v156_v19 = vmin.f32 %v154_v17, 0.9999  ;;  %v1345_v17 = vadd.s32 208, %v1267_v55 }
  0x88   :  { %927 = vlog2.f32 %v155_v18  ;;  %v167_v20 = vsub.f32 1.0, %v155_v18 }
  0x89   :  { %929 = vlog2.f32 %v156_v19  ;;  %v168_v22 = vsub.f32 1.0, %v156_v19 }
  0x95   :  { %v928_v21 = vpop.eup %927 }
  0x96   :  { %v930_v23 = vpop.eup %929  ;;  %v158_v24 = vmul.f32 0.6931472, %v928_v21  ;;  %v1357_v21 = vadd.s32 240, %v1267_v55 }
  0x97   :  { %v160_v26 = vmul.f32 0.6931472, %v930_v23 }
  0x98   :  { %v179_v28 = vmul.f32 %v167_v20, %v158_v24  ;;  %v161_v29 = vsub.f32 %v158_v24, %v137_v0  ;;  %v1294_v0 = vadd.s32 72, %v1267_v55 }
  0x99   :  { %v162_v30 = vsub.f32 %v160_v26, %v138_v1  ;;  %v180_v31 = vmul.f32 %v168_v22, %v160_v26  ;;  %v1297_v1 = vadd.s32 80, %v1267_v55 }
  0x9a   :  { %v181_v32 = vmul.f32 %v179_v28, %v167_v20  ;;  %v163_v33 = vmax.f32 %v161_v29, -9.2103405  ;;  %v1354_v20 = vadd.s32 232, %v1267_v55 }
  0x9b   :  { %v164_v35 = vmax.f32 %v162_v30, -9.2103405  ;;  %v182_v36 = vmul.f32 %v180_v31, %v168_v22  ;;  %v1360_v22 = vadd.s32 248, %v1267_v55 }
  0x9c   :  { %v183_v38 = vsel %vm175_vm0, %v181_v32, 0.0  ;;  %v165_v39 = vmin.f32 %v163_v33, -0.000100005 }
  0x9d   :  { %v166_v40 = vmin.f32 %v164_v35, -0.000100005  ;;  %v184_v41 = vsel %vm176_vm1, %v182_v36, 0.0 }
  0x9e   :  { %v193_v42 = vadd.f32 %v184_v41, %v183_v38  ;;  %v185_v44 = vmul.f32 %v165_v39, %v155_v18 }
  0x9f   :  { %v186_v46 = vmul.f32 %v166_v40, %v156_v19 }
  0xa0   :  { %194 = vadd.xlane.f32.xlu0 %v193_v42  ;;  %v187_v47 = vmul.f32 %v185_v44, %v155_v18  ;;  %v1348_v18 = vadd.s32 216, %v1267_v55 }
  0xa1   :  { %v188_v48 = vmul.f32 %v186_v46, %v156_v19  ;;  %v1351_v19 = vadd.s32 224, %v1267_v55 }
  0xa2   :  { %v189_v49 = vmul.f32 %v187_v47, %v173_v43 }
  0xa3   :  { %v190_v50 = vmul.f32 %v188_v48, %v174_v45 }
  0xa4   :  { %v191_v51 = vsel %vm177_vm2, %v189_v49, 0.0 }
  0xa5   :  { %v192_v52 = vsel %vm178_vm3, %v190_v50, 0.0 }
  0xa6   :  { %v203_v53 = vadd.f32 %v192_v52, %v191_v51 }
  0xa8   :  { %204 = vadd.xlane.f32.xlu0 %v203_v53 }
  0xf2   :  { %v219_v23 = vpop.xlane.xlu1 %218 }
  0xf3   :  { %v220_v25 = vrot.slane %v219_v23, 4 }
  0xf5   :  { %v221_v28 = vadd.f32 %v220_v25, %v219_v23 }
  0xf7   :  { %v222_v31 = vrot.slane %v221_v28, 2 }
  0xf9   :  { %v223_v37 = vadd.f32 %v222_v31, %v221_v28 }
  0xfb   :  { %v224_v40 = vrot.slane %v223_v37, 1 }
  0xfd   :  { %v225_v43 = vadd.f32 %v224_v40, %v223_v37 }
 0x129   :  { %v195_v24 = vpop.xlane.xlu0 %194 }
 0x12a   :  { %v196_v26 = vrot.slane %v195_v24, 4 }
 0x12c   :  { %v197_v27 = vadd.f32 %v196_v26, %v195_v24 }
 0x12e   :  { %v198_v29 = vrot.slane %v197_v27, 2 }
 0x130   :  { %v199_v30 = vadd.f32 %v198_v29, %v197_v27 }
 0x131   :  { %v205_v32 = vpop.xlane.xlu0 %204 }
 0x132   :  { %v206_v33 = vrot.slane %v205_v32, 4  ;;  %v200_v34 = vrot.slane %v199_v30, 1 }
 0x134   :  { %v207_v35 = vadd.f32 %v206_v33, %v205_v32  ;;  %v201_v36 = vadd.f32 %v200_v34, %v199_v30 }
 0x136   :  { %v208_v38 = vrot.slane %v207_v35, 2  ;;  %852 = vpush %v201_v36 }
 0x138   :  { %v209_v39 = vadd.f32 %v208_v38, %v207_v35 }
 0x13a   :  { %v210_v41 = vrot.slane %v209_v39, 1 }
 0x13c   :  { %v211_v42 = vadd.f32 %v210_v41, %v209_v39 }
 0x13e   :  { %854 = vpush %v211_v42 }
 0x13f   :  { %856 = vpush %v225_v43 }
 0x167   :  { %s1362_s7 = spop %852 }
 0x16f   :  { %s1364_s8 = spop %854 }
 0x170   :  { %s1366_s30 = spop %856 }
 0x171 LB: > { %p270_p12 = scmp.lt.s32.totalorder %s1145_s15, 1  ;;  %v1162_v45 = vmov 1.0   ;;  %v467_v48 = vsub.s32 0, %v1267_v55  ;;  %p269_p13 = scmp.lt.s32.totalorder %s1145_s15, 2  ;;  %s1145_s15 = sphi %s1372_s15, %s265_s15   ;;  %s1141_s14 = sphi %s1370_s14, %s1584_s14   ;;  %s1137_s13 = sphi %s1368_s13, %s1583_s13  }
 0x173   : > { %s1385_s16 = scalar_select %p270_p12, %s1145_s15, 1 }
 0x174   : > { %s265_s15 = sadd.s32 1, %s1145_s15  }
 0x175   : > { %s272_s17 = scalar_lea.vmem [#allocation10], %s1385_s16  ;;  %s816_s5 = sshll.u32 %s1385_s16, 2 }
 0x176   : > { %v1388_v44 = vld [vmem:[%s272_s17] ss:$0 sm:$0xff]  ;;  %s280_s19 = scalar_lea.vmem [#allocation7], %s816_s5  ;;  %s747_s20 = sshll.u32 %s1385_s16, 1 }
 0x177   : > { %vm317_vm4 = vcmp.eq.s32.totalorder %v1360_v22, %v1388_v44  ;;  %vm301_vm5 = vcmp.eq.s32.totalorder %v1312_v6, %v1388_v44  ;;  %vm316_vm6 = vcmp.eq.s32.totalorder %v1357_v21, %v1388_v44  ;;  %vm300_vm7 = vcmp.eq.s32.totalorder %v1309_v5, %v1388_v44  ;;  %v782_v46 = vld.sshfl [vmem:[%s280_s19] sm:$0x33 pattern:$0x76325410]  ;;  %s274_s21 = scalar_lea.vmem [#allocation11], %s1385_s16  ;;  %s277_s23 = scalar_lea.vmem [#allocation8], %s747_s20 }
 0x178   : > { %817 = vmatprep.subr.msk.mxu0 %vm317_vm4, %v1162_v45  ;;  %vm315_vm8 = vcmp.eq.s32.totalorder %v1354_v20, %v1388_v44  ;;  %vm299_vm9 = vcmp.eq.s32.totalorder %v1306_v4, %v1388_v44  ;;  %vm314_vm10 = vcmp.eq.s32.totalorder %v1351_v19, %v1388_v44  ;;  %vm298_vm11 = vcmp.eq.s32.totalorder %v1303_v3, %v1388_v44  ;;  %v275_v50 = vld [vmem:[%s274_s21] sm:$0x1]  ;;  %p262_p0 = scmp.ge.s32.totalorder %s265_s15, 2  }
 0x179   : > { %818 = vmatpush3.msk.msra.mxu0 %vm301_vm5, %v1162_v45  ;;  %vm313_vm12 = vcmp.eq.s32.totalorder %v1348_v18, %v1388_v44  ;;  %vm297_vm13 = vcmp.eq.s32.totalorder %v1300_v2, %v1388_v44  ;;  %vm312_vm14 = vcmp.eq.s32.totalorder %v1345_v17, %v1388_v44  ;;  %v390_v47 = vcombine.high %v782_v46, %v782_v46  ;;  %v278_v51 = vld [vmem:[%s277_s23] sm:$0x3]  ;;  %s1163_s28 = smov (%p262_p0), 6   ;;  %s1164_s3 = smov (%p262_p0), 126  }
 0x17a   : > { %819 = vmatprep.subr.msk.mxu0 %vm316_vm6, %v1162_v45  ;;  %vm296_vm15 = vcmp.eq.s32.totalorder %v1297_v1, %v1388_v44  ;;  %vm311_vm0 = vcmp.eq.s32.totalorder %v1342_v16, %v1388_v44  ;;  %vm295_vm1 = vcmp.eq.s32.totalorder %v1294_v0, %v1388_v44  ;;  %vm310_vm2 = vcmp.eq.s32.totalorder %v1339_v15, %v1388_v44  ;;  %s1165_s12 = smov (%p262_p0), 14   ;;  %s1166_s4 = smov (%p262_p0), 124  }
 0x17b   : > { %820 = vmatpush3.msk.msra.mxu0 %vm300_vm7, %v1162_v45  ;;  %457 = vmatprep.mubr.f32.mxu0 %v390_v47  ;;  %vm294_vm3 = vcmp.eq.s32.totalorder %v1291_v63, %v1388_v44  ;;  %vm309_vm4 = vcmp.eq.s32.totalorder %v1336_v14, %v1388_v44  ;;  %vm293_vm5 = vcmp.eq.s32.totalorder %v1288_v62, %v1388_v44  ;;  %v1509_v47 = vld [vmem:[%s1576_s6] sm:$0x3f] (%p262_p0)  ;;  %s1167_s6 = smov (%p262_p0), 12   ;;  %s1168_s29 = smov (%p262_p0), 122  }
 0x17c   : > { %821 = vmatprep.subr.msk.mxu0 %vm315_vm8, %v1162_v45  ;;  %vm308_vm6 = vcmp.eq.s32.totalorder %v1333_v13, %v1388_v44  ;;  %vm292_vm7 = vcmp.eq.s32.totalorder %v1285_v61, %v1388_v44  ;;  %vm307_vm8 = vcmp.eq.s32.totalorder %v1330_v12, %v1388_v44  ;;  %v468_v54 = vrot.slane %v275_v50, %v467_v48  ;;  %s1172_s15 = smov (%p262_p0), 118   ;;  %s1173_s16 = smov (%p262_p0), 116  }
 0x17d   : > { %822 = vmatpush3.msk.msra.mxu0 %vm299_vm9, %v1162_v45  ;;  %vm291_vm9 = vcmp.eq.s32.totalorder %v1282_v60, %v1388_v44  ;;  %s1174_s17 = smov (%p262_p0), 114  }
 0x17e   : > { %823 = vmatprep.subr.msk.mxu0 %vm314_vm10, %v1162_v45  ;;  %vm306_vm10 = vcmp.eq.s32.totalorder %v1327_v11, %v1388_v44 }
 0x17f   : > { %824 = vmatpush3.msk.msra.mxu0 %vm298_vm11, %v1162_v45  ;;  %vm290_vm11 = vcmp.eq.s32.totalorder %v1279_v59, %v1388_v44 }
 0x180   : > { %825 = vmatprep.subr.msk.mxu0 %vm313_vm12, %v1162_v45  ;;  %vm305_vm12 = vcmp.eq.s32.totalorder %v1324_v10, %v1388_v44 }
 0x181   : > { %826 = vmatpush3.msk.msra.mxu0 %vm297_vm13, %v1162_v45  ;;  %vm289_vm13 = vcmp.eq.s32.totalorder %v1276_v58, %v1388_v44 }
 0x182   : > { %827 = vmatprep.subr.msk.mxu0 %vm312_vm14, %v1162_v45  ;;  %vm304_vm14 = vcmp.eq.s32.totalorder %v1321_v9, %v1388_v44 }
 0x183   : > { %828 = vmatpush3.msk.msra.mxu0 %vm296_vm15, %v1162_v45  ;;  %vm288_vm15 = vcmp.eq.s32.totalorder %v1273_v57, %v1388_v44 }
 0x184   : > { %829 = vmatprep.subr.msk.mxu0 %vm311_vm0, %v1162_v45  ;;  %vm303_vm0 = vcmp.eq.s32.totalorder %v1318_v8, %v1388_v44 }
 0x185   : > { %830 = vmatpush3.msk.msra.mxu0 %vm295_vm1, %v1162_v45  ;;  %vm287_vm1 = vcmp.eq.s32.totalorder %v1270_v56, %v1388_v44  ;;  %v1520_v56 = vld [vmem:[#allocation14] sm:$0x3f] (%p262_p0) }
 0x186   : > { %831 = vmatprep.subr.msk.mxu0 %vm310_vm2, %v1162_v45  ;;  %vm302_vm2 = vcmp.eq.s32.totalorder %v1315_v7, %v1388_v44 }
 0x187   : > { %832 = vmatpush3.msk.msra.mxu0 %vm294_vm3, %v1162_v45  ;;  %vm286_vm3 = vcmp.eq.s32.totalorder %v1267_v55, %v1388_v44 }
 0x188   : > { %833 = vmatprep.subr.msk.mxu0 %vm309_vm4, %v1162_v45 }
 0x189   : > { %834 = vmatpush3.msk.msra.mxu0 %vm293_vm5, %v1162_v45  ;;  %vm477_vm5 = vcmask 58368  }
 0x18a   : > { %835 = vmatprep.subr.msk.mxu0 %vm308_vm6, %v1162_v45  ;;  %vm490_vm6 = vcmask 57344  }
 0x18b   : > { %836 = vmatpush3.msk.msra.mxu0 %vm292_vm7, %v1162_v45  ;;  %v491_v31 = vsel %vm490_vm6, %v275_v50, 0.0  ;;  %vm527_vm7 = vcmask (%p262_p0), 62464   ;;  %vm700_vm6 = vcmp.eq.s32.totalorder (%p262_p0), %v1267_v55, 5 }
 0x18c   : > { %837 = vmatprep.subr.msk.mxu0 %vm307_vm8, %v1162_v45  ;;  %vm589_vm8 = vcmask (%p262_p0), 128000  }
 0x18d   : > { %838 = vmatpush3.msk.msra.mxu0 %vm291_vm9, %v1162_v45  ;;  %vm538_vm9 = vcmask (%p262_p0), 48128  }
 0x18e   : > { %839 = vmatprep.subr.msk.mxu0 %vm306_vm10, %v1162_v45  ;;  %vm614_vm10 = vcmask (%p262_p0), 97280  }
 0x18f   : > { %840 = vmatpush3.msk.msra.mxu0 %vm290_vm11, %v1162_v45  ;;  %vm552_vm11 = vcmask (%p262_p0), 31744  }
 0x190   : > { %841 = vmatprep.subr.msk.mxu0 %vm305_vm12, %v1162_v45  ;;  %vm642_vm12 = vcmask (%p262_p0), 64512  }
 0x191   : > { %842 = vmatpush3.msk.msra.mxu0 %vm289_vm13, %v1162_v45  ;;  %vm600_vm13 = vcmask (%p262_p0), 113664  }
 0x192   : > { %843 = vmatprep.subr.msk.mxu0 %vm304_vm14, %v1162_v45  ;;  %vm566_vm14 = vcmask (%p262_p0), 15360  }
 0x193   : > { %844 = vmatpush3.msk.msra.mxu0 %vm288_vm15, %v1162_v45  ;;  %vm628_vm15 = vcmask (%p262_p0), 80896  }
 0x194   : > { %845 = vmatprep.subr.msk.mxu0 %vm303_vm0, %v1162_v45  ;;  %vm574_vm0 = vcmask (%p262_p0), 5120  }
 0x195   : > { %846 = vmatpush3.msk.msra.mxu0 %vm287_vm1, %v1162_v45  ;;  %vm503_vm1 = vcmp.eq.s32.totalorder (%p262_p0), %v1267_v55, 0 }
 0x196   : > { %847 = vmatprep.subr.msk.mxu0 %vm302_vm2, %v1162_v45  ;;  %vm506_vm2 = vcmp.eq.s32.totalorder (%p262_p0), %v1267_v55, 1 }
 0x197   : > { %848 = vmatpush3.msk.msra.mxu0 %vm286_vm3, %v1162_v45  ;;  %vm509_vm3 = vcmp.eq.s32.totalorder (%p262_p0), %v1267_v55, 2 }
 0x198   : > { %458 = vmatmul.mubr.f32.vlgmr.msra.gmra.mxu0 %v782_v46  ;;  %v524_v46 = vld [vmem:[#allocation13] sm:$0x3f] (%p262_p0) }
 0x199   :  { %535 = vrot.lane.b32.xlu1 (%p262_p0), %v524_v46, %s1163_s28  ;;  %v525_v48 = vsub.f32 (%p262_p0), %v1509_v47, %v524_v46 }
 0x19b   :  { %v526_v50 = vand.u32 (%p262_p0), 2147483647, %v525_v48 }
 0x20b   :  { %v536_v60 = vpop.permute.xlu1 (%p262_p0), %535 }
 0x258   : > { %v849_v49 = vpop.f32.mrf.mxu0 }
 0x25a   : > { %v850_v52 = vpop.f32.mrf.mxu0 }
 0x25b   : > { %v851_v53 = vadd.f32 %v850_v52, %v849_v49  ;;  %v586_v49 = vld [vmem:[%s1579_s9] sm:$0x3f] (%p262_p0)  ;;  %s1171_s9 = smov (%p262_p0), 120  }
 0x25c   :  { %594 = vrot.lane.b32.xlu1 (%p262_p0), %v586_v49, %s1164_s3  ;;  %v587_v57 = vsub.f32 (%p262_p0), %v1520_v56, %v586_v49 }
 0x25d   : > { %v463_v23 = vsub.f32 %v851_v53, %v278_v51  ;;  %v528_v51 = vsel (%p262_p0), %vm527_vm7, %v526_v50, 0.0 }
 0x25e   :  { %v588_v58 = vand.u32 (%p262_p0), 2147483647, %v587_v57 }
 0x25f   : > { %v470_v24 = vmul.f32 %v468_v54, %v463_v23 }
 0x260   :  { %597 = vrot.lane.b32.xlu1 (%p262_p0), %v586_v49, %s1165_s12  ;;  %v590_v59 = vsel (%p262_p0), %vm589_vm8, %v588_v58, 0.0 }
 0x261   : > { %v471_v25 = vand.u32 2147483647, %v470_v24  ;;  %v473_v26 = vmul.f32 0.5, %v470_v24 }
 0x263   : > { %vm472_vm4 = vcmp.lt.f32.partialorder %v471_v25, 1.0  ;;  %v474_v27 = vmul.f32 %v473_v26, %v470_v24  ;;  %v815_v28 = vadd.f32 -0.5, %v471_v25 }
 0x264   :  { %608 = vrot.lane.b32.xlu1 (%p262_p0), %v586_v49, %s1166_s4 }
 0x265   : > { %v476_v29 = vsel %vm472_vm4, %v474_v27, %v815_v28  ;;  %vm512_vm4 = vcmp.eq.s32.totalorder (%p262_p0), %v1267_v55, 3 }
 0x266   : > { %v478_v30 = vsel %vm477_vm5, %v476_v29, 0.0  ;;  %vm515_vm5 = vcmp.eq.s32.totalorder (%p262_p0), %v1267_v55, 4 }
 0x267   : > { %479 = vadd.xlane.f32.xlu0 %v478_v30 }
 0x268   :  { %611 = vrot.lane.b32.xlu1 (%p262_p0), %v586_v49, %s1167_s6 }
 0x26b   : > { %492 = vadd.xlane.f32.xlu0 %v491_v31 }
 0x26c   :  { %622 = vrot.lane.b32.xlu1 (%p262_p0), %v586_v49, %s1168_s29 }
 0x26f   :  { %529 = vadd.xlane.f32.xlu0 (%p262_p0), %v528_v51 }
 0x285   :  { %532 = vrot.lane.b32.xlu0 (%p262_p0), %v524_v46, %s1164_s3 }
 0x289   :  { %636 = vrot.lane.b32.xlu0 (%p262_p0), %v586_v49, %s1171_s9 }
 0x28d   :  { %650 = vrot.lane.b32.xlu0 (%p262_p0), %v586_v49, %s1172_s15 }
 0x291   :  { %546 = vrot.lane.b32.xlu0 (%p262_p0), %v524_v46, %s1166_s4 }
 0x295   :  { %663 = vrot.lane.b32.xlu0 (%p262_p0), %v586_v49, %s1173_s16 }
 0x299   :  { %560 = vrot.lane.b32.xlu0 (%p262_p0), %v524_v46, %s1168_s29 }
 0x29d   :  { %676 = vrot.lane.b32.xlu0 (%p262_p0), %v586_v49, %s1174_s17 }
 0x2ce   :  { %v595_v61 = vpop.permute.xlu1 (%p262_p0), %594 }
 0x2d2   :  { %v598_v62 = vpop.permute.xlu1 (%p262_p0), %597 }
 0x2d3   :  { %v601_v52 = vsel (%p262_p0), %vm600_vm13, %v595_v61, %v598_v62 }
 0x2d4   :  { %v602_v27 = vsub.f32 (%p262_p0), %v1520_v56, %v601_v52 }
 0x2d6   :  { %v609_v63 = vpop.permute.xlu1 (%p262_p0), %608 }
 0x2da   :  { %v612_v0 = vpop.permute.xlu1 (%p262_p0), %611 }
 0x2db   :  { %v615_v14 = vsel (%p262_p0), %vm614_vm10, %v609_v63, %v612_v0 }
 0x2dc   :  { %v616_v18 = vsub.f32 (%p262_p0), %v1520_v56, %v615_v14 }
 0x2de   :  { %v623_v1 = vpop.permute.xlu1 (%p262_p0), %622  ;;  %v617_v24 = vand.u32 (%p262_p0), 2147483647, %v616_v18 }
 0x2e0   :  { %v618_v31 = vsel (%p262_p0), %vm589_vm8, %v617_v24, 0.0 }
 0x2f0   : > { %v480_v32 = vpop.xlane.xlu0 %479 }
 0x2f1   : > { %v481_v33 = vrot.slane %v480_v32, 4 }
 0x2f3   : > { %v482_v34 = vadd.f32 %v481_v33, %v480_v32 }
 0x2f4   : > { %v493_v35 = vpop.xlane.xlu0 %492 }
 0x2f5   : > { %v483_v36 = vrot.slane %v482_v34, 2  ;;  %v494_v37 = vrot.slane %v493_v35, 4 }
 0x2f7   : > { %v495_v38 = vadd.f32 %v494_v37, %v493_v35  ;;  %v484_v39 = vadd.f32 %v483_v36, %v482_v34  ;;  %v603_v35 = vand.u32 (%p262_p0), 2147483647, %v602_v27 }
 0x2f8   :  { %v1524_v3 = vpop.xlane.xlu0 (%p262_p0), %529 }
 0x2f9   : > { %v496_v40 = vrot.slane %v495_v38, 2  ;;  %v485_v41 = vrot.slane %v484_v39, 1 }
 0x2fb   : > { %v497_v42 = vadd.f32 %v496_v40, %v495_v38  ;;  %v486_v43 = vadd.f32 %v485_v41, %v484_v39 }
 0x2fc   :  { %v533_v5 = vpop.permute.xlu0 (%p262_p0), %532 }
 0x2fd   : > { %858 = vpush %v486_v43  ;;  %v498_v44 = vrot.slane %v497_v42, 1  ;;  %v539_v7 = vsel (%p262_p0), %vm538_vm9, %v533_v5, %v536_v60  ;;  %v604_v43 = vsel (%p262_p0), %vm589_vm8, %v603_v35, 0.0 }
 0x2fe   :  { %v540_v8 = vsub.f32 (%p262_p0), %v1509_v47, %v539_v7 }
 0x2ff   : > { %v499_v45 = vadd.f32 %v498_v44, %v497_v42 }
 0x300   :  { %v637_v9 = vpop.permute.xlu0 (%p262_p0), %636  ;;  %v541_v10 = vand.u32 (%p262_p0), 2147483647, %v540_v8 }
 0x301   : > { %860 = vpush %v499_v45 }
 0x302   :  { %v542_v11 = vsel (%p262_p0), %vm527_vm7, %v541_v10, 0.0 }
 0x303   :  { %543 = vadd.xlane.f32.xlu0 (%p262_p0), %v542_v11 }
 0x304   :  { %v651_v13 = vpop.permute.xlu0 (%p262_p0), %650 }
 0x308   :  { %v547_v15 = vpop.permute.xlu0 (%p262_p0), %546 }
 0x30c   :  { %v664_v21 = vpop.permute.xlu0 (%p262_p0), %663 }
 0x310   :  { %v561_v26 = vpop.permute.xlu0 (%p262_p0), %560 }
 0x32e   : > { %s859_s0 = spop %858 }
 0x32f   : > { %s1586_s0 = smov (!%p269_p13, %s859_s0), 0.0 }
 0x330   : > { %s1492_s14 = sadd.f32 %s1141_s14, %s1586_s0  }
 0x332   : > { %s1581_s24 = smov %s1492_s14  ;;  %s861_s25 = spop %860 }
 0x333   : > { %s1588_s25 = smov (!%p269_p13, %s861_s25), 0.0  ;;  %s1584_s14 = smov %s1581_s24 }
 0x334   : > { %s1495_s13 = sadd.f32 %s1137_s13, %s1588_s25   ;;  %264 = sbr.rel (!%p262_p0) target bundleno = 369 (0x171), region = 107 }
 0x335   :  { %s1170_s14 = smov (%p262_p0), 8  }
 0x336   : > { %s1582_s26 = smov %s1495_s13 }
 0x337   : > { %s1583_s13 = smov %s1582_s26 }
 0x338   :  { %s1169_s13 = smov (%p262_p0), 10  }
 0x339   :  { %625 = vrot.lane.b32.xlu1 %v586_v49, %s1169_s13 }
 0x33d   :  { %639 = vrot.lane.b32.xlu1 %v586_v49, %s1170_s14 }
 0x341   :  { %653 = vrot.lane.b32.xlu1 %v586_v49, %s1163_s28 }
 0x345   :  { %549 = vrot.lane.b32.xlu1 %v524_v46, %s1157_s18 }
 0x349   :  { %666 = vrot.lane.b32.xlu1 %v586_v49, %s1157_s18  ;;  %s1175_s18 = smov [#allocation16]  }
 0x34d   :  { %563 = vrot.lane.b32.xlu1 %v524_v46, %s1150_s22 }
 0x351   :  { %679 = vrot.lane.b32.xlu1 %v586_v49, %s1150_s22  ;;  %v677_v49 = vpop.permute.xlu0 %676 }
 0x375   :  { %591 = vadd.xlane.f32.xlu1 %v590_v59 }
 0x38c   :  { %v544_v51 = vpop.xlane.xlu0 %543 }
 0x38d   :  { %v545_v59 = vmin.f32 %v1524_v3, %v544_v51 }
 0x3ab   :  { %v626_v2 = vpop.permute.xlu1 %625 }
 0x3ac   :  { %v629_v33 = vsel %vm628_vm15, %v623_v1, %v626_v2 }
 0x3ad   :  { %v630_v36 = vsub.f32 %v1520_v56, %v629_v33 }
 0x3af   :  { %v640_v4 = vpop.permute.xlu1 %639  ;;  %v631_v44 = vand.u32 2147483647, %v630_v36  ;;  %v516_v36 = vstv %s1582_s26 }
 0x3b0   :  { %v643_v20 = vsel %vm642_vm12, %v637_v9, %v640_v4 }
 0x3b1   :  { %v644_v53 = vsub.f32 %v1520_v56, %v643_v20  ;;  %v632_v45 = vsel %vm589_vm8, %v631_v44, 0.0 }
 0x3b3   :  { %v654_v6 = vpop.permute.xlu1 %653  ;;  %v645_v32 = vand.u32 2147483647, %v644_v53 }
 0x3b4   :  { %v656_v40 = vsel %vm538_vm9, %v651_v13, %v654_v6 }
 0x3b5   :  { %v646_v37 = vsel %vm589_vm8, %v645_v32, 0.0  ;;  %v657_v41 = vsub.f32 %v1520_v56, %v656_v40  ;;  %v510_v32 = vstv %s1366_s30 }
 0x3b7   :  { %v550_v12 = vpop.permute.xlu1 %549  ;;  %v658_v46 = vand.u32 2147483647, %v657_v41 }
 0x3b8   :  { %v553_v17 = vsel %vm552_vm11, %v547_v15, %v550_v12 }
 0x3b9   :  { %v554_v19 = vsub.f32 %v1509_v47, %v553_v17 }
 0x3bb   :  { %v667_v16 = vpop.permute.xlu1 %666  ;;  %v555_v22 = vand.u32 2147483647, %v554_v19 }
 0x3bc   :  { %v669_v25 = vsel %vm552_vm11, %v664_v21, %v667_v16 }
 0x3bd   :  { %v556_v54 = vsel %vm527_vm7, %v555_v22, 0.0  ;;  %v670_v29 = vsub.f32 %v1520_v56, %v669_v25 }
 0x3be   :  { %557 = vadd.xlane.f32.xlu1 %v556_v54 }
 0x3bf   :  { %v564_v23 = vpop.permute.xlu1 %563  ;;  %v671_v39 = vand.u32 2147483647, %v670_v29 }
 0x3c0   :  { %v567_v28 = vsel %vm566_vm14, %v561_v26, %v564_v23 }
 0x3c1   :  { %v568_v30 = vsub.f32 %v1509_v47, %v567_v28  ;;  %v672_v42 = vsel %vm589_vm8, %v671_v39, 0.0  ;;  %v659_v47 = vsel %vm589_vm8, %v658_v46, 0.0  ;;  %v504_v28 = vstv %s1362_s7  ;;  %s713_s7 = sshll.u32 %s1175_s18, 4  ;;  %s714_s7 = int_to_ptr.vmem [resolvable:$true] %s713_s7 }
 0x3c2   :  { %619 = vadd.xlane.f32.xlu1 %v618_v31  ;;  %v505_v29 = vsel %vm503_vm1, %v504_v28, 0.0  ;;  %s1091_s30 = scalar_lea.vmem %s714_s7, 128  ;;  %p1096_p2 = scmp.lt.s32.totalorder %s714_s7, %s714_s7 }
 0x3c3   :  { %v569_v34 = vand.u32 2147483647, %v568_v30  ;;  %v680_v48 = vpop.permute.xlu1 %679  ;;  %v507_v30 = vstv %s1364_s8  ;;  %p1092_p1 = scmp.ne.s32.totalorder %s714_s7, %s1091_s30  ;;  %p1097_p3 = scmp.lt.s32.totalorder %s1091_s30, %s1091_s30 }
 0x3c4   :  { %v682_v57 = vsel %vm566_vm14, %v677_v49, %v680_v48  ;;  %v508_v31 = vsel %vm506_vm2, %v507_v30, %v505_v29 }
 0x3c5   :  { %v570_v38 = vsel %vm527_vm7, %v569_v34, 0.0  ;;  %v683_v60 = vsub.f32 %v1520_v56, %v682_v57  ;;  %v511_v33 = vsel %vm509_vm3, %v510_v32, %v508_v31  ;;  %v513_v34 = vstv %s1581_s24  ;;  %p1098_p4 = por %p1097_p3, %p1096_p2 }
 0x3c6   :  { %647 = vadd.xlane.f32.xlu1 %v646_v37  ;;  %571 = vadd.xlane.f32.xlu0 %v570_v38  ;;  %v514_v35 = vsel %vm512_vm4, %v513_v34, %v511_v33  ;;  %vm703_vm7 = vcmp.eq.s32.totalorder %v1267_v55, 6 }
 0x3c7   :  { %v684_v1 = vand.u32 2147483647, %v683_v60  ;;  %v517_v37 = vsel %vm515_vm5, %v516_v36, %v514_v35  ;;  %p1099_p5 = pnand %p1098_p4, %p1092_p1 }
 0x3c9   :  { %v685_v2 = vsel %vm589_vm8, %v684_v1, 0.0 }
 0x3ca   :  { %673 = vadd.xlane.f32.xlu1 %v672_v42  ;;  %605 = vadd.xlane.f32.xlu0 %v604_v43 }
 0x3ce   :  { %633 = vadd.xlane.f32.xlu0 %v632_v45 }
 0x3d2   :  { %660 = vadd.xlane.f32.xlu0 %v659_v47 }
 0x3fe   :  { %v592_v50 = vpop.xlane.xlu1 %591 }
 0x447   :  { %v558_v58 = vpop.xlane.xlu1 %557 }
 0x448   :  { %v559_v61 = vmin.f32 %v545_v59, %v558_v58 }
 0x44b   :  { %v620_v6 = vpop.xlane.xlu1 %619 }
 0x44f   :  { %v572_v62 = vpop.xlane.xlu0 %571  ;;  %v648_v3 = vpop.xlane.xlu1 %647 }
 0x450   :  { %v573_v63 = vmin.f32 %v559_v61, %v572_v62 }
 0x452   :  { %v575_v0 = vsel %vm574_vm0, %v573_v63, 0.0 }
 0x453   :  { %576 = vadd.xlane.f32.xlu0 %v575_v0  ;;  %v606_v4 = vpop.xlane.xlu0 %605  ;;  %v674_v14 = vpop.xlane.xlu1 %673 }
 0x454   :  { %v607_v5 = vmin.f32 %v592_v50, %v606_v4 }
 0x456   :  { %v621_v7 = vmin.f32 %v607_v5, %v620_v6 }
 0x457   :  { %686 = vadd.xlane.f32.xlu0 %v685_v2  ;;  %v634_v8 = vpop.xlane.xlu0 %633 }
 0x458   :  { %v635_v9 = vmin.f32 %v621_v7, %v634_v8 }
 0x45a   :  { %v649_v10 = vmin.f32 %v635_v9, %v648_v3 }
 0x45b   :  { %v661_v56 = vpop.xlane.xlu0 %660 }
 0x45c   :  { %v662_v11 = vmin.f32 %v649_v10, %v661_v56 }
 0x45e   :  { %v675_v16 = vmin.f32 %v662_v11, %v674_v14 }
 0x4dc   :  { %v577_v12 = vpop.xlane.xlu0 %576 }
 0x4dd   :  { %v578_v13 = vrot.slane %v577_v12, 4 }
 0x4df   :  { %v579_v15 = vadd.f32 %v578_v13, %v577_v12 }
 0x4e0   :  { %v687_v17 = vpop.xlane.xlu0 %686 }
 0x4e1   :  { %v580_v18 = vrot.slane %v579_v15, 2  ;;  %v688_v19 = vmin.f32 %v675_v16, %v687_v17 }
 0x4e3   :  { %v689_v20 = vsel %vm574_vm0, %v688_v19, 0.0  ;;  %v581_v21 = vadd.f32 %v580_v18, %v579_v15 }
 0x4e4   :  { %690 = vadd.xlane.f32.xlu1 %v689_v20 }
 0x4e5   :  { %v582_v22 = vrot.slane %v581_v21, 1 }
 0x4e7   :  { %v583_v52 = vadd.f32 %v582_v22, %v581_v21 }
 0x4e9   :  { %862 = vpush %v583_v52 }
 0x51a   :  { %s863_s22 = spop %862 }
 0x51b   :  { %v701_v38 = vstv %s863_s22 }
 0x51c   :  { %v702_v39 = vsel %vm700_vm6, %v701_v38, %v517_v37 }
 0x56d   :  { %v691_v53 = vpop.xlane.xlu1 %690 }
 0x56e   :  { %v692_v54 = vrot.slane %v691_v53, 4 }
 0x570   :  { %v693_v23 = vadd.f32 %v692_v54, %v691_v53 }
 0x572   :  { %v694_v24 = vrot.slane %v693_v23, 2 }
 0x574   :  { %v695_v25 = vadd.f32 %v694_v24, %v693_v23 }
 0x576   :  { %v696_v26 = vrot.slane %v695_v25, 1 }
 0x578   :  { %v697_v27 = vadd.f32 %v696_v26, %v695_v25 }
 0x57a   :  { %864 = vpush %v697_v27 }
 0x5ab   :  { %s865_s8 = spop %864 }
 0x5ac   :  { %v704_v40 = vstv %s865_s8 }
 0x5ad   :  { %v705_v41 = vsel %vm703_vm7, %v704_v40, %v702_v39 }
 0x5ae   :  { %706 = vst [vmem:[#allocation16] sm:$0xff] %v705_v41 }
 0x5af   :  { %1102 = shalt.err (!%p1099_p5)
}
 0x5b0   :  { %716 = dma.vmem_to_hbm [thread:$0]  %s714_s7, 128, %s1580_s10, [#allocation4]  }
 0x5b1   :  { %1133 = dma.done.wait [#allocation4], 128  }
 0x5b2   :  { %1134 = vsyncadd [#allocation4], 4294967168 }
 0x5b3   :  { %720 = vsyncpa [#allocation3], 1 }
 0x5b4   :  { %721 = vsyncpa [#allocation6], 1 }
 0x5b5   :  { %722 = vsyncpa [#allocation9], 1 }
 0x5b6   :  { %723 = vsyncpa [#allocation12], 1 }
 0x5b7   :  { %724 = vsyncpa [#allocation15], 1 }
 0x5b8   :  { %725 = vsyncpa [#allocation4], 1 }

</bundles_post_ra>
